<compile_context>
chip_gen: v7x
topology: tpu7x:2x2x1
jax: 0.10.0
libtpu: 0.0.40
codegen_flags: <defaults>
</compile_context>

<pallas_src>
import functools

import jax
import jax.numpy as jnp
import numpy as np
from jax.experimental import pallas as pl
from jax.experimental.pallas import tpu as pltpu

# ----------------------------- configuration --------------------------------
B = 2          # batch
L = 8          # sequence length
D_MODEL = 32   # d_model
N_HEADS = 4
D_HEAD = D_MODEL // N_HEADS
D_FF = 4 * D_MODEL
LN_EPS = 1e-5
BL = B * L
D = D_MODEL


def _layernorm(x, g, b):
    mu = jnp.mean(x, axis=-1, keepdims=True)
    var = jnp.mean((x - mu) ** 2, axis=-1, keepdims=True)
    return (x - mu) * jax.lax.rsqrt(var + LN_EPS) * g + b


# ----------------------------- fused Pallas kernel ---------------------------
def encoder_kernel(data_ref, w_ref, bias_ref, w2_ref, out_ref, attn_ref):
    # data_ref: (2, B*L, D) -> slab 0 = x (values), slab 1 = cross (queries/keys)
    x = data_ref[0]        # (BL, D)
    cross = data_ref[1]    # (BL, D)

    # ---- packed bias / LN slab: (4, 128) ----
    #   row 0: [bq | bk | bv | bo]
    #   row 1: b_ff1
    #   row 2: [ln1_g | ln1_b | b_ff2 | ln2_g]
    #   row 3: [ln2_b | 0 | 0 | 0]
    bias = bias_ref[...]
    bqk = bias[0:1, 0:2 * D]          # (1, 64)
    bv  = bias[0:1, 2 * D:3 * D]      # (1, 32)
    bo  = bias[0:1, 3 * D:4 * D]
    b1  = bias[1:2, :]                # (1, 128)
    g1  = bias[2:3, 0:D]
    be1 = bias[2:3, D:2 * D]
    bf2 = bias[2:3, 2 * D:3 * D]
    g2  = bias[2:3, 3 * D:4 * D]
    be2 = bias[3:4, 0:D]

    # ---- fused Q/K projection (one MXU issue) and V projection ----
    # weight slab layout: rows 0:32 = [Wq | Wk | Wv | Wo], rows 32:64 = W_ff1
    qk = jnp.dot(cross, w_ref[0:D, 0:2 * D],
                 preferred_element_type=jnp.float32) + bqk          # (BL, 64)
    v = jnp.dot(x, w_ref[0:D, 2 * D:3 * D],
                preferred_element_type=jnp.float32) + bv            # (BL, 32)

    # ---- per-(batch, head) softmax attention, fully unrolled; Wo applied per head ----
    scale = 1.0 / jnp.sqrt(jnp.float32(D_HEAD))
    newx_blocks = []
    for b in range(B):
        rs = b * L
        acc = jnp.zeros((L, D), jnp.float32)        # per-batch output-projection accumulator
        for h in range(N_HEADS):
            cs = h * D_HEAD
            qh = qk[rs:rs + L, cs:cs + D_HEAD]                   # (L, Dh), sliced from fused qk
            kh = qk[rs:rs + L, D + cs:D + cs + D_HEAD]
            vh = v[rs:rs + L, cs:cs + D_HEAD]
            # q @ k^T without materializing a transpose
            s = jax.lax.dot_general(qh, kh, (((1,), (1,)), ((), ())),
                                    preferred_element_type=jnp.float32) * scale
            s = s - jnp.max(s, axis=-1, keepdims=True)
            p = jnp.exp(s)
            a = p / jnp.sum(p, axis=-1, keepdims=True)           # exact div (1e-4 tolerance)
            idx = b * N_HEADS + h
            attn_ref[idx * L:(idx + 1) * L, :] = a               # direct sublane-aligned store
            ctx_h = jnp.dot(a, vh, preferred_element_type=jnp.float32)       # (L, Dh)
            wo_h = w_ref[cs:cs + D_HEAD, 3 * D:4 * D]                        # (Dh, D)
            acc = acc + jnp.dot(ctx_h, wo_h, preferred_element_type=jnp.float32)
        newx_blocks.append(acc)
    new_x = jnp.concatenate(newx_blocks, axis=0)   # (BL, D) — sublane-aligned, cheap

    # ---- output projection bias + residual + LayerNorm1 ----
    x1 = x + new_x + bo
    xn = _layernorm(x1, g1, be1)

    # ---- FFN: conv1(k=1) -> relu -> conv2(k=1) ----
    w1 = w_ref[D:2 * D, :]                          # (32, 128)
    y = jnp.dot(xn, w1, preferred_element_type=jnp.float32) + b1
    y = jnp.maximum(y, 0.0)
    y = jnp.dot(y, w2_ref[...], preferred_element_type=jnp.float32) + bf2

    # ---- residual (on the normed xn, as in the PyTorch module) + LayerNorm2 ----
    out = _layernorm(xn + y, g2, be2)

    # ---- stacked output written directly from the kernel ----
    out_ref[0] = out
    out_ref[1] = cross


def _full_spec(shape):
    n = len(shape)
    return pl.BlockSpec(shape, lambda i: (0,) * n)


def encoder_layer_forward(data, params):
    """data: (2, B, L, D).  Returns (stacked (2,B,L,D), attn (B,H,L,L))."""
    data_flat = data.reshape(2, BL, D_MODEL)                     # free reshape

    # single (64, 128) lane-dense weight slab
    proj = jnp.concatenate([params["wq"], params["wk"],
                            params["wv"], params["wo"]], axis=1)  # (32, 128)
    wslab = jnp.concatenate([proj, params["w_ff1"]], axis=0)      # (64, 128)

    # single (4, 128) bias / LN slab
    zeros32 = jnp.zeros((D_MODEL,), jnp.float32)
    row0 = jnp.concatenate([params["bq"], params["bk"], params["bv"], params["bo"]])
    row1 = params["b_ff1"]
    row2 = jnp.concatenate([params["ln1_g"], params["ln1_b"],
                            params["b_ff2"], params["ln2_g"]])
    row3 = jnp.concatenate([params["ln2_b"], zeros32, zeros32, zeros32])
    bias_slab = jnp.stack([row0, row1, row2, row3], axis=0)       # (4, 128)

    stacked_flat, attn_flat = pl.pallas_call(
        encoder_kernel,
        grid=(1,),
        out_shape=(
            jax.ShapeDtypeStruct((2, BL, D_MODEL), jnp.float32),
            jax.ShapeDtypeStruct((B * N_HEADS * L, L), jnp.float32),
        ),
        in_specs=[
            _full_spec((2, BL, D_MODEL)),          # data (x, cross) slabs
            _full_spec((2 * D_MODEL, 4 * D_MODEL)),  # [Wq|Wk|Wv|Wo ; W_ff1]
            _full_spec((4, 4 * D_MODEL)),          # packed biases / LN params
            _full_spec((D_FF, D_MODEL)),           # conv2 weight (as dense)
        ],
        out_specs=(
            _full_spec((2, BL, D_MODEL)),
            _full_spec((B * N_HEADS * L, L)),
        ),
        input_output_aliases={0: 0},               # donate data buffer as stacked output
        compiler_params=pltpu.CompilerParams(dimension_semantics=("arbitrary",)),
    )(data_flat, wslab, bias_slab, params["w_ff2"])

    stacked = stacked_flat.reshape(2, B, L, D_MODEL)             # free reshapes
    attn = attn_flat.reshape(B, N_HEADS, L, L)
    return stacked, attn


# ----------------------------- reference (plain JAX) -------------------------
def layernorm_ref(x, g, b):
    mu = jnp.mean(x, axis=-1, keepdims=True)
    var = jnp.mean((x - mu) ** 2, axis=-1, keepdims=True)
    return (x - mu) / jnp.sqrt(var + LN_EPS) * g + b


def encoder_layer_ref(data, params):
    x, cross = data[0], data[1]
    q = (cross @ params["wq"] + params["bq"]).reshape(B, L, N_HEADS, D_HEAD)
    k = (cross @ params["wk"] + params["bk"]).reshape(B, L, N_HEADS, D_HEAD)
    v = (x @ params["wv"] + params["bv"]).reshape(B, L, N_HEADS, D_HEAD)
    s = jnp.einsum("blhe,bshe->bhls", q, k) / jnp.sqrt(jnp.float32(D_HEAD))
    a = jax.nn.softmax(s, axis=-1)
    ctx = jnp.einsum("bhls,bshe->blhe", a, v).reshape(B, L, D_MODEL)
    new_x = ctx @ params["wo"] + params["bo"]
    xn = layernorm_ref(x + new_x, params["ln1_g"], params["ln1_b"])
    y = jnp.maximum(xn @ params["w_ff1"] + params["b_ff1"], 0.0)
    y = y @ params["w_ff2"] + params["b_ff2"]
    out = layernorm_ref(xn + y, params["ln2_g"], params["ln2_b"])
    return jnp.stack((out, cross)), a


# ----------------------------- main -------------------------------------------
def make_params(key):
    ks = jax.random.split(key, 8)
    init = lambda k, shape: (0.02 * jax.random.normal(k, shape)).astype(jnp.float32)
    return {
        "wq": init(ks[0], (D_MODEL, D_MODEL)), "bq": init(ks[1], (D_MODEL,)),
        "wk": init(ks[2], (D_MODEL, D_MODEL)), "bk": init(ks[3], (D_MODEL,)),
        "wv": init(ks[4], (D_MODEL, D_MODEL)), "bv": init(ks[5], (D_MODEL,)),
        "wo": init(ks[6], (D_MODEL, D_MODEL)), "bo": jnp.zeros((D_MODEL,), jnp.float32),
        "w_ff1": init(ks[7], (D_MODEL, D_FF)), "b_ff1": jnp.zeros((D_FF,), jnp.float32),
        "w_ff2": init(jax.random.fold_in(key, 99), (D_FF, D_MODEL)),
        "b_ff2": jnp.zeros((D_MODEL,), jnp.float32),
        "ln1_g": jnp.ones((D_MODEL,), jnp.float32), "ln1_b": jnp.zeros((D_MODEL,), jnp.float32),
        "ln2_g": jnp.ones((D_MODEL,), jnp.float32), "ln2_b": jnp.zeros((D_MODEL,), jnp.float32),
    }


if __name__ == "__main__":
    key = jax.random.PRNGKey(0)
    k_data, k_param = jax.random.split(key)
    # data is the stacked pair (x, cross) the module consumes / re-emits.
    data = jax.random.normal(k_data, (2, B, L, D_MODEL), dtype=jnp.float32)
    params = make_params(k_param)

    fwd = jax.jit(functools.partial(encoder_layer_forward, params=params))
    stacked, attn = fwd(data)
    jax.block_until_ready((stacked, attn))

    stacked_ref, attn_ref = encoder_layer_ref(data, params)
    np.testing.assert_allclose(np.asarray(stacked), np.asarray(stacked_ref),
                               rtol=1e-4, atol=1e-4)
    np.testing.assert_allclose(np.asarray(attn), np.asarray(attn_ref),
                               rtol=1e-4, atol=1e-4)

    assert stacked.shape == (2, B, L, D_MODEL)
    assert attn.shape == (B, N_HEADS, L, L)
    print("KERNEL_OK")
</pallas_src>

<mosaic_0001>
module attributes {stable_mosaic.version = 11 : i64} {
  func.func @encoder_kernel(%arg0: i32, %arg1: memref<2x16x32xf32, #tpu.memory_space<vmem>>, %arg2: memref<64x128xf32, #tpu.memory_space<vmem>>, %arg3: memref<4x128xf32, #tpu.memory_space<vmem>>, %arg4: memref<128x32xf32, #tpu.memory_space<vmem>>, %arg5: memref<2x16x32xf32, #tpu.memory_space<vmem>>, %arg6: memref<64x8xf32, #tpu.memory_space<vmem>>) attributes {dimension_semantics = [#tpu.dimension_semantics<arbitrary>], iteration_bounds = array<i64: 1>, scalar_prefetch = 0 : i64, scratch_operands = 0 : i64, tpu.core_type = #tpu.core_type<tc>, window_params = [{pipeline_mode = #tpu.pipeline_mode<synchronous>, transform_indices = @transform_0, window_bounds = array<i64: 2, 16, 32>}, {pipeline_mode = #tpu.pipeline_mode<synchronous>, transform_indices = @transform_1, window_bounds = array<i64: 64, 128>}, {pipeline_mode = #tpu.pipeline_mode<synchronous>, transform_indices = @transform_2, window_bounds = array<i64: 4, 128>}, {pipeline_mode = #tpu.pipeline_mode<synchronous>, transform_indices = @transform_3, window_bounds = array<i64: 128, 32>}, {pipeline_mode = #tpu.pipeline_mode<synchronous>, transform_indices = @transform_4, window_bounds = array<i64: 2, 16, 32>}, {pipeline_mode = #tpu.pipeline_mode<synchronous>, transform_indices = @transform_5, window_bounds = array<i64: 64, 8>}]} {
    %c0 = arith.constant 0 : index
    %c0_0 = arith.constant 0 : index
    %c0_1 = arith.constant 0 : index
    %0 = vector.load %arg1[%c0, %c0_0, %c0_1] : memref<2x16x32xf32, #tpu.memory_space<vmem>>, vector<1x16x32xf32>
    %1 = vector.shape_cast %0 : vector<1x16x32xf32> to vector<16x32xf32>
    %c1 = arith.constant 1 : index
    %c0_2 = arith.constant 0 : index
    %c0_3 = arith.constant 0 : index
    %2 = vector.load %arg1[%c1, %c0_2, %c0_3] : memref<2x16x32xf32, #tpu.memory_space<vmem>>, vector<1x16x32xf32>
    %3 = vector.shape_cast %2 : vector<1x16x32xf32> to vector<16x32xf32>
    %c0_4 = arith.constant 0 : index
    %c0_5 = arith.constant 0 : index
    %4 = vector.load %arg3[%c0_4, %c0_5] : memref<4x128xf32, #tpu.memory_space<vmem>>, vector<4x128xf32>
    %5 = vector.extract_strided_slice %4 {offsets = [0, 0], sizes = [1, 64], strides = [1, 1]} : vector<4x128xf32> to vector<1x64xf32>
    %6 = vector.extract_strided_slice %4 {offsets = [0, 64], sizes = [1, 32], strides = [1, 1]} : vector<4x128xf32> to vector<1x32xf32>
    %7 = vector.extract_strided_slice %4 {offsets = [0, 96], sizes = [1, 32], strides = [1, 1]} : vector<4x128xf32> to vector<1x32xf32>
    %8 = vector.extract_strided_slice %4 {offsets = [1, 0], sizes = [1, 128], strides = [1, 1]} : vector<4x128xf32> to vector<1x128xf32>
    %9 = vector.extract_strided_slice %4 {offsets = [2, 0], sizes = [1, 32], strides = [1, 1]} : vector<4x128xf32> to vector<1x32xf32>
    %10 = vector.extract_strided_slice %4 {offsets = [2, 32], sizes = [1, 32], strides = [1, 1]} : vector<4x128xf32> to vector<1x32xf32>
    %11 = vector.extract_strided_slice %4 {offsets = [2, 64], sizes = [1, 32], strides = [1, 1]} : vector<4x128xf32> to vector<1x32xf32>
    %12 = vector.extract_strided_slice %4 {offsets = [2, 96], sizes = [1, 32], strides = [1, 1]} : vector<4x128xf32> to vector<1x32xf32>
    %13 = vector.extract_strided_slice %4 {offsets = [3, 0], sizes = [1, 32], strides = [1, 1]} : vector<4x128xf32> to vector<1x32xf32>
    %c0_6 = arith.constant 0 : index
    %c0_7 = arith.constant 0 : index
    %14 = vector.load %arg2[%c0_6, %c0_7] : memref<64x128xf32, #tpu.memory_space<vmem>>, vector<32x64xf32>
    %cst = arith.constant dense<0.000000e+00> : vector<16x64xf32>
    %15 = tpu.matmul %3, %14, %cst {dimension_numbers = #tpu.dot_dimension_numbers<[1], [0], [0], [1], [0, 0, 1, 1], [], []>} : vector<16x32xf32>, vector<32x64xf32>, vector<16x64xf32> -> vector<16x64xf32>
    %16 = vector.broadcast %5 : vector<1x64xf32> to vector<16x64xf32>
    %17 = arith.addf %15, %16 : vector<16x64xf32>
    %c0_8 = arith.constant 0 : index
    %c64 = arith.constant 64 : index
    %18 = vector.load %arg2[%c0_8, %c64] : memref<64x128xf32, #tpu.memory_space<vmem>>, vector<32x32xf32>
    %cst_9 = arith.constant dense<0.000000e+00> : vector<16x32xf32>
    %19 = tpu.matmul %1, %18, %cst_9 {dimension_numbers = #tpu.dot_dimension_numbers<[1], [0], [0], [1], [0, 0, 1, 1], [], []>} : vector<16x32xf32>, vector<32x32xf32>, vector<16x32xf32> -> vector<16x32xf32>
    %20 = vector.broadcast %6 : vector<1x32xf32> to vector<16x32xf32>
    %21 = arith.addf %19, %20 : vector<16x32xf32>
    %cst_10 = arith.constant 8.000000e+00 : f32
    %22 = math.sqrt %cst_10 : f32
    %cst_11 = arith.constant 1.000000e+00 : f32
    %23 = arith.divf %cst_11, %22 : f32
    %cst_12 = arith.constant 0.000000e+00 : f32
    %24 = vector.broadcast %cst_12 : f32 to vector<8x32xf32>
    %25 = vector.extract_strided_slice %17 {offsets = [0, 0], sizes = [8, 8], strides = [1, 1]} : vector<16x64xf32> to vector<8x8xf32>
    %26 = vector.extract_strided_slice %17 {offsets = [0, 32], sizes = [8, 8], strides = [1, 1]} : vector<16x64xf32> to vector<8x8xf32>
    %27 = vector.extract_strided_slice %21 {offsets = [0, 0], sizes = [8, 8], strides = [1, 1]} : vector<16x32xf32> to vector<8x8xf32>
    %cst_13 = arith.constant dense<0.000000e+00> : vector<8x8xf32>
    %28 = tpu.matmul %25, %26, %cst_13 {dimension_numbers = #tpu.dot_dimension_numbers<[1], [1], [0], [0], [0, 0, 1, 0], [], []>} : vector<8x8xf32>, vector<8x8xf32>, vector<8x8xf32> -> vector<8x8xf32>
    %29 = vector.broadcast %23 : f32 to vector<8x8xf32>
    %30 = arith.mulf %28, %29 : vector<8x8xf32>
    %cst_14 = arith.constant dense<0xFF800000> : vector<8xf32>
    %31 = vector.multi_reduction <maximumf>, %30, %cst_14 [1] : vector<8x8xf32> to vector<8xf32>
    %32 = vector.shape_cast %31 : vector<8xf32> to vector<8x1xf32>
    %33 = vector.broadcast %32 : vector<8x1xf32> to vector<8x8xf32>
    %34 = arith.subf %30, %33 : vector<8x8xf32>
    %35 = math.exp %34 : vector<8x8xf32>
    %cst_15 = arith.constant dense<0.000000e+00> : vector<8xf32>
    %36 = vector.multi_reduction <add>, %35, %cst_15 [1] : vector<8x8xf32> to vector<8xf32>
    %37 = vector.shape_cast %36 : vector<8xf32> to vector<8x1xf32>
    %38 = vector.broadcast %37 : vector<8x1xf32> to vector<8x8xf32>
    %39 = arith.divf %35, %38 : vector<8x8xf32>
    %c0_16 = arith.constant 0 : index
    %c0_17 = arith.constant 0 : index
    %40 = vector.load %arg6[%c0_16, %c0_17] : memref<64x8xf32, #tpu.memory_space<vmem>>, vector<8x8xf32>
    tpu.vector_store %arg6[%c0_16, %c0_17], %39 {strides = array<i32>} : memref<64x8xf32, #tpu.memory_space<vmem>>, vector<8x8xf32>,
    %cst_18 = arith.constant dense<0.000000e+00> : vector<8x8xf32>
    %41 = tpu.matmul %39, %27, %cst_18 {dimension_numbers = #tpu.dot_dimension_numbers<[1], [0], [0], [1], [0, 0, 1, 1], [], []>} : vector<8x8xf32>, vector<8x8xf32>, vector<8x8xf32> -> vector<8x8xf32>
    %c0_19 = arith.constant 0 : index
    %c96 = arith.constant 96 : index
    %42 = vector.load %arg2[%c0_19, %c96] : memref<64x128xf32, #tpu.memory_space<vmem>>, vector<8x32xf32>
    %cst_20 = arith.constant dense<0.000000e+00> : vector<8x32xf32>
    %43 = tpu.matmul %41, %42, %cst_20 {dimension_numbers = #tpu.dot_dimension_numbers<[1], [0], [0], [1], [0, 0, 1, 1], [], []>} : vector<8x8xf32>, vector<8x32xf32>, vector<8x32xf32> -> vector<8x32xf32>
    %44 = arith.addf %24, %43 : vector<8x32xf32>
    %45 = vector.extract_strided_slice %17 {offsets = [0, 8], sizes = [8, 8], strides = [1, 1]} : vector<16x64xf32> to vector<8x8xf32>
    %46 = vector.extract_strided_slice %17 {offsets = [0, 40], sizes = [8, 8], strides = [1, 1]} : vector<16x64xf32> to vector<8x8xf32>
    %47 = vector.extract_strided_slice %21 {offsets = [0, 8], sizes = [8, 8], strides = [1, 1]} : vector<16x32xf32> to vector<8x8xf32>
    %cst_21 = arith.constant dense<0.000000e+00> : vector<8x8xf32>
    %48 = tpu.matmul %45, %46, %cst_21 {dimension_numbers = #tpu.dot_dimension_numbers<[1], [1], [0], [0], [0, 0, 1, 0], [], []>} : vector<8x8xf32>, vector<8x8xf32>, vector<8x8xf32> -> vector<8x8xf32>
    %49 = vector.broadcast %23 : f32 to vector<8x8xf32>
    %50 = arith.mulf %48, %49 : vector<8x8xf32>
    %cst_22 = arith.constant dense<0xFF800000> : vector<8xf32>
    %51 = vector.multi_reduction <maximumf>, %50, %cst_22 [1] : vector<8x8xf32> to vector<8xf32>
    %52 = vector.shape_cast %51 : vector<8xf32> to vector<8x1xf32>
    %53 = vector.broadcast %52 : vector<8x1xf32> to vector<8x8xf32>
    %54 = arith.subf %50, %53 : vector<8x8xf32>
    %55 = math.exp %54 : vector<8x8xf32>
    %cst_23 = arith.constant dense<0.000000e+00> : vector<8xf32>
    %56 = vector.multi_reduction <add>, %55, %cst_23 [1] : vector<8x8xf32> to vector<8xf32>
    %57 = vector.shape_cast %56 : vector<8xf32> to vector<8x1xf32>
    %58 = vector.broadcast %57 : vector<8x1xf32> to vector<8x8xf32>
    %59 = arith.divf %55, %58 : vector<8x8xf32>
    %c8 = arith.constant 8 : index
    %c0_24 = arith.constant 0 : index
    %60 = vector.load %arg6[%c8, %c0_24] : memref<64x8xf32, #tpu.memory_space<vmem>>, vector<8x8xf32>
    tpu.vector_store %arg6[%c8, %c0_24], %59 {strides = array<i32>} : memref<64x8xf32, #tpu.memory_space<vmem>>, vector<8x8xf32>,
    %cst_25 = arith.constant dense<0.000000e+00> : vector<8x8xf32>
    %61 = tpu.matmul %59, %47, %cst_25 {dimension_numbers = #tpu.dot_dimension_numbers<[1], [0], [0], [1], [0, 0, 1, 1], [], []>} : vector<8x8xf32>, vector<8x8xf32>, vector<8x8xf32> -> vector<8x8xf32>
    %c8_26 = arith.constant 8 : index
    %c96_27 = arith.constant 96 : index
    %62 = vector.load %arg2[%c8_26, %c96_27] : memref<64x128xf32, #tpu.memory_space<vmem>>, vector<8x32xf32>
    %cst_28 = arith.constant dense<0.000000e+00> : vector<8x32xf32>
    %63 = tpu.matmul %61, %62, %cst_28 {dimension_numbers = #tpu.dot_dimension_numbers<[1], [0], [0], [1], [0, 0, 1, 1], [], []>} : vector<8x8xf32>, vector<8x32xf32>, vector<8x32xf32> -> vector<8x32xf32>
    %64 = arith.addf %44, %63 : vector<8x32xf32>
    %65 = vector.extract_strided_slice %17 {offsets = [0, 16], sizes = [8, 8], strides = [1, 1]} : vector<16x64xf32> to vector<8x8xf32>
    %66 = vector.extract_strided_slice %17 {offsets = [0, 48], sizes = [8, 8], strides = [1, 1]} : vector<16x64xf32> to vector<8x8xf32>
    %67 = vector.extract_strided_slice %21 {offsets = [0, 16], sizes = [8, 8], strides = [1, 1]} : vector<16x32xf32> to vector<8x8xf32>
    %cst_29 = arith.constant dense<0.000000e+00> : vector<8x8xf32>
    %68 = tpu.matmul %65, %66, %cst_29 {dimension_numbers = #tpu.dot_dimension_numbers<[1], [1], [0], [0], [0, 0, 1, 0], [], []>} : vector<8x8xf32>, vector<8x8xf32>, vector<8x8xf32> -> vector<8x8xf32>
    %69 = vector.broadcast %23 : f32 to vector<8x8xf32>
    %70 = arith.mulf %68, %69 : vector<8x8xf32>
    %cst_30 = arith.constant dense<0xFF800000> : vector<8xf32>
    %71 = vector.multi_reduction <maximumf>, %70, %cst_30 [1] : vector<8x8xf32> to vector<8xf32>
    %72 = vector.shape_cast %71 : vector<8xf32> to vector<8x1xf32>
    %73 = vector.broadcast %72 : vector<8x1xf32> to vector<8x8xf32>
    %74 = arith.subf %70, %73 : vector<8x8xf32>
    %75 = math.exp %74 : vector<8x8xf32>
    %cst_31 = arith.constant dense<0.000000e+00> : vector<8xf32>
    %76 = vector.multi_reduction <add>, %75, %cst_31 [1] : vector<8x8xf32> to vector<8xf32>
    %77 = vector.shape_cast %76 : vector<8xf32> to vector<8x1xf32>
    %78 = vector.broadcast %77 : vector<8x1xf32> to vector<8x8xf32>
    %79 = arith.divf %75, %78 : vector<8x8xf32>
    %c16 = arith.constant 16 : index
    %c0_32 = arith.constant 0 : index
    %80 = vector.load %arg6[%c16, %c0_32] : memref<64x8xf32, #tpu.memory_space<vmem>>, vector<8x8xf32>
    tpu.vector_store %arg6[%c16, %c0_32], %79 {strides = array<i32>} : memref<64x8xf32, #tpu.memory_space<vmem>>, vector<8x8xf32>,
    %cst_33 = arith.constant dense<0.000000e+00> : vector<8x8xf32>
    %81 = tpu.matmul %79, %67, %cst_33 {dimension_numbers = #tpu.dot_dimension_numbers<[1], [0], [0], [1], [0, 0, 1, 1], [], []>} : vector<8x8xf32>, vector<8x8xf32>, vector<8x8xf32> -> vector<8x8xf32>
    %c16_34 = arith.constant 16 : index
    %c96_35 = arith.constant 96 : index
    %82 = vector.load %arg2[%c16_34, %c96_35] : memref<64x128xf32, #tpu.memory_space<vmem>>, vector<8x32xf32>
    %cst_36 = arith.constant dense<0.000000e+00> : vector<8x32xf32>
    %83 = tpu.matmul %81, %82, %cst_36 {dimension_numbers = #tpu.dot_dimension_numbers<[1], [0], [0], [1], [0, 0, 1, 1], [], []>} : vector<8x8xf32>, vector<8x32xf32>, vector<8x32xf32> -> vector<8x32xf32>
    %84 = arith.addf %64, %83 : vector<8x32xf32>
    %85 = vector.extract_strided_slice %17 {offsets = [0, 24], sizes = [8, 8], strides = [1, 1]} : vector<16x64xf32> to vector<8x8xf32>
    %86 = vector.extract_strided_slice %17 {offsets = [0, 56], sizes = [8, 8], strides = [1, 1]} : vector<16x64xf32> to vector<8x8xf32>
    %87 = vector.extract_strided_slice %21 {offsets = [0, 24], sizes = [8, 8], strides = [1, 1]} : vector<16x32xf32> to vector<8x8xf32>
    %cst_37 = arith.constant dense<0.000000e+00> : vector<8x8xf32>
    %88 = tpu.matmul %85, %86, %cst_37 {dimension_numbers = #tpu.dot_dimension_numbers<[1], [1], [0], [0], [0, 0, 1, 0], [], []>} : vector<8x8xf32>, vector<8x8xf32>, vector<8x8xf32> -> vector<8x8xf32>
    %89 = vector.broadcast %23 : f32 to vector<8x8xf32>
    %90 = arith.mulf %88, %89 : vector<8x8xf32>
    %cst_38 = arith.constant dense<0xFF800000> : vector<8xf32>
    %91 = vector.multi_reduction <maximumf>, %90, %cst_38 [1] : vector<8x8xf32> to vector<8xf32>
    %92 = vector.shape_cast %91 : vector<8xf32> to vector<8x1xf32>
    %93 = vector.broadcast %92 : vector<8x1xf32> to vector<8x8xf32>
    %94 = arith.subf %90, %93 : vector<8x8xf32>
    %95 = math.exp %94 : vector<8x8xf32>
    %cst_39 = arith.constant dense<0.000000e+00> : vector<8xf32>
    %96 = vector.multi_reduction <add>, %95, %cst_39 [1] : vector<8x8xf32> to vector<8xf32>
    %97 = vector.shape_cast %96 : vector<8xf32> to vector<8x1xf32>
    %98 = vector.broadcast %97 : vector<8x1xf32> to vector<8x8xf32>
    %99 = arith.divf %95, %98 : vector<8x8xf32>
    %c24 = arith.constant 24 : index
    %c0_40 = arith.constant 0 : index
    %100 = vector.load %arg6[%c24, %c0_40] : memref<64x8xf32, #tpu.memory_space<vmem>>, vector<8x8xf32>
    tpu.vector_store %arg6[%c24, %c0_40], %99 {strides = array<i32>} : memref<64x8xf32, #tpu.memory_space<vmem>>, vector<8x8xf32>,
    %cst_41 = arith.constant dense<0.000000e+00> : vector<8x8xf32>
    %101 = tpu.matmul %99, %87, %cst_41 {dimension_numbers = #tpu.dot_dimension_numbers<[1], [0], [0], [1], [0, 0, 1, 1], [], []>} : vector<8x8xf32>, vector<8x8xf32>, vector<8x8xf32> -> vector<8x8xf32>
    %c24_42 = arith.constant 24 : index
    %c96_43 = arith.constant 96 : index
    %102 = vector.load %arg2[%c24_42, %c96_43] : memref<64x128xf32, #tpu.memory_space<vmem>>, vector<8x32xf32>
    %cst_44 = arith.constant dense<0.000000e+00> : vector<8x32xf32>
    %103 = tpu.matmul %101, %102, %cst_44 {dimension_numbers = #tpu.dot_dimension_numbers<[1], [0], [0], [1], [0, 0, 1, 1], [], []>} : vector<8x8xf32>, vector<8x32xf32>, vector<8x32xf32> -> vector<8x32xf32>
    %104 = arith.addf %84, %103 : vector<8x32xf32>
    %cst_45 = arith.constant 0.000000e+00 : f32
    %105 = vector.broadcast %cst_45 : f32 to vector<8x32xf32>
    %106 = vector.extract_strided_slice %17 {offsets = [8, 0], sizes = [8, 8], strides = [1, 1]} : vector<16x64xf32> to vector<8x8xf32>
    %107 = vector.extract_strided_slice %17 {offsets = [8, 32], sizes = [8, 8], strides = [1, 1]} : vector<16x64xf32> to vector<8x8xf32>
    %108 = vector.extract_strided_slice %21 {offsets = [8, 0], sizes = [8, 8], strides = [1, 1]} : vector<16x32xf32> to vector<8x8xf32>
    %cst_46 = arith.constant dense<0.000000e+00> : vector<8x8xf32>
    %109 = tpu.matmul %106, %107, %cst_46 {dimension_numbers = #tpu.dot_dimension_numbers<[1], [1], [0], [0], [0, 0, 1, 0], [], []>} : vector<8x8xf32>, vector<8x8xf32>, vector<8x8xf32> -> vector<8x8xf32>
    %110 = vector.broadcast %23 : f32 to vector<8x8xf32>
    %111 = arith.mulf %109, %110 : vector<8x8xf32>
    %cst_47 = arith.constant dense<0xFF800000> : vector<8xf32>
    %112 = vector.multi_reduction <maximumf>, %111, %cst_47 [1] : vector<8x8xf32> to vector<8xf32>
    %113 = vector.shape_cast %112 : vector<8xf32> to vector<8x1xf32>
    %114 = vector.broadcast %113 : vector<8x1xf32> to vector<8x8xf32>
    %115 = arith.subf %111, %114 : vector<8x8xf32>
    %116 = math.exp %115 : vector<8x8xf32>
    %cst_48 = arith.constant dense<0.000000e+00> : vector<8xf32>
    %117 = vector.multi_reduction <add>, %116, %cst_48 [1] : vector<8x8xf32> to vector<8xf32>
    %118 = vector.shape_cast %117 : vector<8xf32> to vector<8x1xf32>
    %119 = vector.broadcast %118 : vector<8x1xf32> to vector<8x8xf32>
    %120 = arith.divf %116, %119 : vector<8x8xf32>
    %c32 = arith.constant 32 : index
    %c0_49 = arith.constant 0 : index
    %121 = vector.load %arg6[%c32, %c0_49] : memref<64x8xf32, #tpu.memory_space<vmem>>, vector<8x8xf32>
    tpu.vector_store %arg6[%c32, %c0_49], %120 {strides = array<i32>} : memref<64x8xf32, #tpu.memory_space<vmem>>, vector<8x8xf32>,
    %cst_50 = arith.constant dense<0.000000e+00> : vector<8x8xf32>
    %122 = tpu.matmul %120, %108, %cst_50 {dimension_numbers = #tpu.dot_dimension_numbers<[1], [0], [0], [1], [0, 0, 1, 1], [], []>} : vector<8x8xf32>, vector<8x8xf32>, vector<8x8xf32> -> vector<8x8xf32>
    %c0_51 = arith.constant 0 : index
    %c96_52 = arith.constant 96 : index
    %123 = vector.load %arg2[%c0_51, %c96_52] : memref<64x128xf32, #tpu.memory_space<vmem>>, vector<8x32xf32>
    %cst_53 = arith.constant dense<0.000000e+00> : vector<8x32xf32>
    %124 = tpu.matmul %122, %123, %cst_53 {dimension_numbers = #tpu.dot_dimension_numbers<[1], [0], [0], [1], [0, 0, 1, 1], [], []>} : vector<8x8xf32>, vector<8x32xf32>, vector<8x32xf32> -> vector<8x32xf32>
    %125 = arith.addf %105, %124 : vector<8x32xf32>
    %126 = vector.extract_strided_slice %17 {offsets = [8, 8], sizes = [8, 8], strides = [1, 1]} : vector<16x64xf32> to vector<8x8xf32>
    %127 = vector.extract_strided_slice %17 {offsets = [8, 40], sizes = [8, 8], strides = [1, 1]} : vector<16x64xf32> to vector<8x8xf32>
    %128 = vector.extract_strided_slice %21 {offsets = [8, 8], sizes = [8, 8], strides = [1, 1]} : vector<16x32xf32> to vector<8x8xf32>
    %cst_54 = arith.constant dense<0.000000e+00> : vector<8x8xf32>
    %129 = tpu.matmul %126, %127, %cst_54 {dimension_numbers = #tpu.dot_dimension_numbers<[1], [1], [0], [0], [0, 0, 1, 0], [], []>} : vector<8x8xf32>, vector<8x8xf32>, vector<8x8xf32> -> vector<8x8xf32>
    %130 = vector.broadcast %23 : f32 to vector<8x8xf32>
    %131 = arith.mulf %129, %130 : vector<8x8xf32>
    %cst_55 = arith.constant dense<0xFF800000> : vector<8xf32>
    %132 = vector.multi_reduction <maximumf>, %131, %cst_55 [1] : vector<8x8xf32> to vector<8xf32>
    %133 = vector.shape_cast %132 : vector<8xf32> to vector<8x1xf32>
    %134 = vector.broadcast %133 : vector<8x1xf32> to vector<8x8xf32>
    %135 = arith.subf %131, %134 : vector<8x8xf32>
    %136 = math.exp %135 : vector<8x8xf32>
    %cst_56 = arith.constant dense<0.000000e+00> : vector<8xf32>
    %137 = vector.multi_reduction <add>, %136, %cst_56 [1] : vector<8x8xf32> to vector<8xf32>
    %138 = vector.shape_cast %137 : vector<8xf32> to vector<8x1xf32>
    %139 = vector.broadcast %138 : vector<8x1xf32> to vector<8x8xf32>
    %140 = arith.divf %136, %139 : vector<8x8xf32>
    %c40 = arith.constant 40 : index
    %c0_57 = arith.constant 0 : index
    %141 = vector.load %arg6[%c40, %c0_57] : memref<64x8xf32, #tpu.memory_space<vmem>>, vector<8x8xf32>
    tpu.vector_store %arg6[%c40, %c0_57], %140 {strides = array<i32>} : memref<64x8xf32, #tpu.memory_space<vmem>>, vector<8x8xf32>,
    %cst_58 = arith.constant dense<0.000000e+00> : vector<8x8xf32>
    %142 = tpu.matmul %140, %128, %cst_58 {dimension_numbers = #tpu.dot_dimension_numbers<[1], [0], [0], [1], [0, 0, 1, 1], [], []>} : vector<8x8xf32>, vector<8x8xf32>, vector<8x8xf32> -> vector<8x8xf32>
    %c8_59 = arith.constant 8 : index
    %c96_60 = arith.constant 96 : index
    %143 = vector.load %arg2[%c8_59, %c96_60] : memref<64x128xf32, #tpu.memory_space<vmem>>, vector<8x32xf32>
    %cst_61 = arith.constant dense<0.000000e+00> : vector<8x32xf32>
    %144 = tpu.matmul %142, %143, %cst_61 {dimension_numbers = #tpu.dot_dimension_numbers<[1], [0], [0], [1], [0, 0, 1, 1], [], []>} : vector<8x8xf32>, vector<8x32xf32>, vector<8x32xf32> -> vector<8x32xf32>
    %145 = arith.addf %125, %144 : vector<8x32xf32>
    %146 = vector.extract_strided_slice %17 {offsets = [8, 16], sizes = [8, 8], strides = [1, 1]} : vector<16x64xf32> to vector<8x8xf32>
    %147 = vector.extract_strided_slice %17 {offsets = [8, 48], sizes = [8, 8], strides = [1, 1]} : vector<16x64xf32> to vector<8x8xf32>
    %148 = vector.extract_strided_slice %21 {offsets = [8, 16], sizes = [8, 8], strides = [1, 1]} : vector<16x32xf32> to vector<8x8xf32>
    %cst_62 = arith.constant dense<0.000000e+00> : vector<8x8xf32>
    %149 = tpu.matmul %146, %147, %cst_62 {dimension_numbers = #tpu.dot_dimension_numbers<[1], [1], [0], [0], [0, 0, 1, 0], [], []>} : vector<8x8xf32>, vector<8x8xf32>, vector<8x8xf32> -> vector<8x8xf32>
    %150 = vector.broadcast %23 : f32 to vector<8x8xf32>
    %151 = arith.mulf %149, %150 : vector<8x8xf32>
    %cst_63 = arith.constant dense<0xFF800000> : vector<8xf32>
    %152 = vector.multi_reduction <maximumf>, %151, %cst_63 [1] : vector<8x8xf32> to vector<8xf32>
    %153 = vector.shape_cast %152 : vector<8xf32> to vector<8x1xf32>
    %154 = vector.broadcast %153 : vector<8x1xf32> to vector<8x8xf32>
    %155 = arith.subf %151, %154 : vector<8x8xf32>
    %156 = math.exp %155 : vector<8x8xf32>
    %cst_64 = arith.constant dense<0.000000e+00> : vector<8xf32>
    %157 = vector.multi_reduction <add>, %156, %cst_64 [1] : vector<8x8xf32> to vector<8xf32>
    %158 = vector.shape_cast %157 : vector<8xf32> to vector<8x1xf32>
    %159 = vector.broadcast %158 : vector<8x1xf32> to vector<8x8xf32>
    %160 = arith.divf %156, %159 : vector<8x8xf32>
    %c48 = arith.constant 48 : index
    %c0_65 = arith.constant 0 : index
    %161 = vector.load %arg6[%c48, %c0_65] : memref<64x8xf32, #tpu.memory_space<vmem>>, vector<8x8xf32>
    tpu.vector_store %arg6[%c48, %c0_65], %160 {strides = array<i32>} : memref<64x8xf32, #tpu.memory_space<vmem>>, vector<8x8xf32>,
    %cst_66 = arith.constant dense<0.000000e+00> : vector<8x8xf32>
    %162 = tpu.matmul %160, %148, %cst_66 {dimension_numbers = #tpu.dot_dimension_numbers<[1], [0], [0], [1], [0, 0, 1, 1], [], []>} : vector<8x8xf32>, vector<8x8xf32>, vector<8x8xf32> -> vector<8x8xf32>
    %c16_67 = arith.constant 16 : index
    %c96_68 = arith.constant 96 : index
    %163 = vector.load %arg2[%c16_67, %c96_68] : memref<64x128xf32, #tpu.memory_space<vmem>>, vector<8x32xf32>
    %cst_69 = arith.constant dense<0.000000e+00> : vector<8x32xf32>
    %164 = tpu.matmul %162, %163, %cst_69 {dimension_numbers = #tpu.dot_dimension_numbers<[1], [0], [0], [1], [0, 0, 1, 1], [], []>} : vector<8x8xf32>, vector<8x32xf32>, vector<8x32xf32> -> vector<8x32xf32>
    %165 = arith.addf %145, %164 : vector<8x32xf32>
    %166 = vector.extract_strided_slice %17 {offsets = [8, 24], sizes = [8, 8], strides = [1, 1]} : vector<16x64xf32> to vector<8x8xf32>
    %167 = vector.extract_strided_slice %17 {offsets = [8, 56], sizes = [8, 8], strides = [1, 1]} : vector<16x64xf32> to vector<8x8xf32>
    %168 = vector.extract_strided_slice %21 {offsets = [8, 24], sizes = [8, 8], strides = [1, 1]} : vector<16x32xf32> to vector<8x8xf32>
    %cst_70 = arith.constant dense<0.000000e+00> : vector<8x8xf32>
    %169 = tpu.matmul %166, %167, %cst_70 {dimension_numbers = #tpu.dot_dimension_numbers<[1], [1], [0], [0], [0, 0, 1, 0], [], []>} : vector<8x8xf32>, vector<8x8xf32>, vector<8x8xf32> -> vector<8x8xf32>
    %170 = vector.broadcast %23 : f32 to vector<8x8xf32>
    %171 = arith.mulf %169, %170 : vector<8x8xf32>
    %cst_71 = arith.constant dense<0xFF800000> : vector<8xf32>
    %172 = vector.multi_reduction <maximumf>, %171, %cst_71 [1] : vector<8x8xf32> to vector<8xf32>
    %173 = vector.shape_cast %172 : vector<8xf32> to vector<8x1xf32>
    %174 = vector.broadcast %173 : vector<8x1xf32> to vector<8x8xf32>
    %175 = arith.subf %171, %174 : vector<8x8xf32>
    %176 = math.exp %175 : vector<8x8xf32>
    %cst_72 = arith.constant dense<0.000000e+00> : vector<8xf32>
    %177 = vector.multi_reduction <add>, %176, %cst_72 [1] : vector<8x8xf32> to vector<8xf32>
    %178 = vector.shape_cast %177 : vector<8xf32> to vector<8x1xf32>
    %179 = vector.broadcast %178 : vector<8x1xf32> to vector<8x8xf32>
    %180 = arith.divf %176, %179 : vector<8x8xf32>
    %c56 = arith.constant 56 : index
    %c0_73 = arith.constant 0 : index
    %181 = vector.load %arg6[%c56, %c0_73] : memref<64x8xf32, #tpu.memory_space<vmem>>, vector<8x8xf32>
    tpu.vector_store %arg6[%c56, %c0_73], %180 {strides = array<i32>} : memref<64x8xf32, #tpu.memory_space<vmem>>, vector<8x8xf32>,
    %cst_74 = arith.constant dense<0.000000e+00> : vector<8x8xf32>
    %182 = tpu.matmul %180, %168, %cst_74 {dimension_numbers = #tpu.dot_dimension_numbers<[1], [0], [0], [1], [0, 0, 1, 1], [], []>} : vector<8x8xf32>, vector<8x8xf32>, vector<8x8xf32> -> vector<8x8xf32>
    %c24_75 = arith.constant 24 : index
    %c96_76 = arith.constant 96 : index
    %183 = vector.load %arg2[%c24_75, %c96_76] : memref<64x128xf32, #tpu.memory_space<vmem>>, vector<8x32xf32>
    %cst_77 = arith.constant dense<0.000000e+00> : vector<8x32xf32>
    %184 = tpu.matmul %182, %183, %cst_77 {dimension_numbers = #tpu.dot_dimension_numbers<[1], [0], [0], [1], [0, 0, 1, 1], [], []>} : vector<8x8xf32>, vector<8x32xf32>, vector<8x32xf32> -> vector<8x32xf32>
    %185 = arith.addf %165, %184 : vector<8x32xf32>
    %186 = tpu.concatenate %104, %185 in 0 : vector<8x32xf32>, vector<8x32xf32> -> vector<16x32xf32>
    %187 = arith.addf %1, %186 : vector<16x32xf32>
    %188 = vector.broadcast %7 : vector<1x32xf32> to vector<16x32xf32>
    %189 = arith.addf %187, %188 : vector<16x32xf32>
    %cst_78 = arith.constant dense<0.000000e+00> : vector<16xf32>
    %190 = vector.multi_reduction <add>, %189, %cst_78 [1] : vector<16x32xf32> to vector<16xf32>
    %191 = vector.shape_cast %190 : vector<16xf32> to vector<16x1xf32>
    %cst_79 = arith.constant 3.200000e+01 : f32
    %192 = vector.broadcast %cst_79 : f32 to vector<16x1xf32>
    %193 = arith.divf %191, %192 : vector<16x1xf32>
    %194 = vector.broadcast %193 : vector<16x1xf32> to vector<16x32xf32>
    %195 = arith.subf %189, %194 : vector<16x32xf32>
    %196 = arith.mulf %195, %195 : vector<16x32xf32>
    %cst_80 = arith.constant dense<0.000000e+00> : vector<16xf32>
    %197 = vector.multi_reduction <add>, %196, %cst_80 [1] : vector<16x32xf32> to vector<16xf32>
    %198 = vector.shape_cast %197 : vector<16xf32> to vector<16x1xf32>
    %cst_81 = arith.constant 3.200000e+01 : f32
    %199 = vector.broadcast %cst_81 : f32 to vector<16x1xf32>
    %200 = arith.divf %198, %199 : vector<16x1xf32>
    %201 = vector.broadcast %193 : vector<16x1xf32> to vector<16x32xf32>
    %202 = arith.subf %189, %201 : vector<16x32xf32>
    %cst_82 = arith.constant 9.99999974E-6 : f32
    %203 = vector.broadcast %cst_82 : f32 to vector<16x1xf32>
    %204 = arith.addf %200, %203 : vector<16x1xf32>
    %205 = math.rsqrt %204 : vector<16x1xf32>
    %206 = vector.broadcast %205 : vector<16x1xf32> to vector<16x32xf32>
    %207 = arith.mulf %202, %206 : vector<16x32xf32>
    %208 = vector.broadcast %9 : vector<1x32xf32> to vector<16x32xf32>
    %209 = arith.mulf %207, %208 : vector<16x32xf32>
    %210 = vector.broadcast %10 : vector<1x32xf32> to vector<16x32xf32>
    %211 = arith.addf %209, %210 : vector<16x32xf32>
    %c32_83 = arith.constant 32 : index
    %c0_84 = arith.constant 0 : index
    %212 = vector.load %arg2[%c32_83, %c0_84] : memref<64x128xf32, #tpu.memory_space<vmem>>, vector<32x128xf32>
    %cst_85 = arith.constant dense<0.000000e+00> : vector<16x128xf32>
    %213 = tpu.matmul %211, %212, %cst_85 {dimension_numbers = #tpu.dot_dimension_numbers<[1], [0], [0], [1], [0, 0, 1, 1], [], []>} : vector<16x32xf32>, vector<32x128xf32>, vector<16x128xf32> -> vector<16x128xf32>
    %214 = vector.broadcast %8 : vector<1x128xf32> to vector<16x128xf32>
    %215 = arith.addf %213, %214 : vector<16x128xf32>
    %cst_86 = arith.constant 0.000000e+00 : f32
    %216 = vector.broadcast %cst_86 : f32 to vector<16x128xf32>
    %217 = arith.maximumf %215, %216 : vector<16x128xf32>
    %c0_87 = arith.constant 0 : index
    %c0_88 = arith.constant 0 : index
    %218 = vector.load %arg4[%c0_87, %c0_88] : memref<128x32xf32, #tpu.memory_space<vmem>>, vector<128x32xf32>
    %cst_89 = arith.constant dense<0.000000e+00> : vector<16x32xf32>
    %219 = tpu.matmul %217, %218, %cst_89 {dimension_numbers = #tpu.dot_dimension_numbers<[1], [0], [0], [1], [0, 0, 1, 1], [], []>} : vector<16x128xf32>, vector<128x32xf32>, vector<16x32xf32> -> vector<16x32xf32>
    %220 = vector.broadcast %11 : vector<1x32xf32> to vector<16x32xf32>
    %221 = arith.addf %219, %220 : vector<16x32xf32>
    %222 = arith.addf %211, %221 : vector<16x32xf32>
    %cst_90 = arith.constant dense<0.000000e+00> : vector<16xf32>
    %223 = vector.multi_reduction <add>, %222, %cst_90 [1] : vector<16x32xf32> to vector<16xf32>
    %224 = vector.shape_cast %223 : vector<16xf32> to vector<16x1xf32>
    %cst_91 = arith.constant 3.200000e+01 : f32
    %225 = vector.broadcast %cst_91 : f32 to vector<16x1xf32>
    %226 = arith.divf %224, %225 : vector<16x1xf32>
    %227 = vector.broadcast %226 : vector<16x1xf32> to vector<16x32xf32>
    %228 = arith.subf %222, %227 : vector<16x32xf32>
    %229 = arith.mulf %228, %228 : vector<16x32xf32>
    %cst_92 = arith.constant dense<0.000000e+00> : vector<16xf32>
    %230 = vector.multi_reduction <add>, %229, %cst_92 [1] : vector<16x32xf32> to vector<16xf32>
    %231 = vector.shape_cast %230 : vector<16xf32> to vector<16x1xf32>
    %cst_93 = arith.constant 3.200000e+01 : f32
    %232 = vector.broadcast %cst_93 : f32 to vector<16x1xf32>
    %233 = arith.divf %231, %232 : vector<16x1xf32>
    %234 = vector.broadcast %226 : vector<16x1xf32> to vector<16x32xf32>
    %235 = arith.subf %222, %234 : vector<16x32xf32>
    %cst_94 = arith.constant 9.99999974E-6 : f32
    %236 = vector.broadcast %cst_94 : f32 to vector<16x1xf32>
    %237 = arith.addf %233, %236 : vector<16x1xf32>
    %238 = math.rsqrt %237 : vector<16x1xf32>
    %239 = vector.broadcast %238 : vector<16x1xf32> to vector<16x32xf32>
    %240 = arith.mulf %235, %239 : vector<16x32xf32>
    %241 = vector.broadcast %12 : vector<1x32xf32> to vector<16x32xf32>
    %242 = arith.mulf %240, %241 : vector<16x32xf32>
    %243 = vector.broadcast %13 : vector<1x32xf32> to vector<16x32xf32>
    %244 = arith.addf %242, %243 : vector<16x32xf32>
    %c0_95 = arith.constant 0 : index
    %c0_96 = arith.constant 0 : index
    %c0_97 = arith.constant 0 : index
    %245 = vector.load %arg5[%c0_95, %c0_96, %c0_97] : memref<2x16x32xf32, #tpu.memory_space<vmem>>, vector<1x16x32xf32>
    %246 = vector.shape_cast %245 : vector<1x16x32xf32> to vector<16x32xf32>
    %247 = vector.shape_cast %244 : vector<16x32xf32> to vector<1x16x32xf32>
    tpu.vector_store %arg5[%c0_95, %c0_96, %c0_97], %247 {strides = array<i32>} : memref<2x16x32xf32, #tpu.memory_space<vmem>>, vector<1x16x32xf32>,
    %c1_98 = arith.constant 1 : index
    %c0_99 = arith.constant 0 : index
    %c0_100 = arith.constant 0 : index
    %248 = vector.load %arg5[%c1_98, %c0_99, %c0_100] : memref<2x16x32xf32, #tpu.memory_space<vmem>>, vector<1x16x32xf32>
    %249 = vector.shape_cast %248 : vector<1x16x32xf32> to vector<16x32xf32>
    %250 = vector.shape_cast %3 : vector<16x32xf32> to vector<1x16x32xf32>
    tpu.vector_store %arg5[%c1_98, %c0_99, %c0_100], %250 {strides = array<i32>} : memref<2x16x32xf32, #tpu.memory_space<vmem>>, vector<1x16x32xf32>,
    return
  }
  func.func @transform_0(%arg0: i32) -> (i32, i32, i32) {
    %c0_i32 = arith.constant 0 : i32
    %c0_i32_0 = arith.constant 0 : i32
    %c0_i32_1 = arith.constant 0 : i32
    %c0_i32_2 = arith.constant 0 : i32
    return %c0_i32, %c0_i32_0, %c0_i32_1 : i32, i32, i32
  }
  func.func @transform_1(%arg0: i32) -> (i32, i32) {
    %c0_i32 = arith.constant 0 : i32
    %c0_i32_0 = arith.constant 0 : i32
    %c0_i32_1 = arith.constant 0 : i32
    return %c0_i32, %c0_i32_0 : i32, i32
  }
  func.func @transform_2(%arg0: i32) -> (i32, i32) {
    %c0_i32 = arith.constant 0 : i32
    %c0_i32_0 = arith.constant 0 : i32
    %c0_i32_1 = arith.constant 0 : i32
    return %c0_i32, %c0_i32_0 : i32, i32
  }
  func.func @transform_3(%arg0: i32) -> (i32, i32) {
    %c0_i32 = arith.constant 0 : i32
    %c0_i32_0 = arith.constant 0 : i32
    %c0_i32_1 = arith.constant 0 : i32
    return %c0_i32, %c0_i32_0 : i32, i32
  }
  func.func @transform_4(%arg0: i32) -> (i32, i32, i32) {
    %c0_i32 = arith.constant 0 : i32
    %c0_i32_0 = arith.constant 0 : i32
    %c0_i32_1 = arith.constant 0 : i32
    %c0_i32_2 = arith.constant 0 : i32
    return %c0_i32, %c0_i32_0, %c0_i32_1 : i32, i32, i32
  }
  func.func @transform_5(%arg0: i32) -> (i32, i32) {
    %c0_i32 = arith.constant 0 : i32
    %c0_i32_0 = arith.constant 0 : i32
    %c0_i32_1 = arith.constant 0 : i32
    return %c0_i32, %c0_i32_0 : i32, i32
  }
}

</mosaic_0001>

<bundles_post_ra>
// kernel: encoder_layer_forward.1
= control target key start
LH: loop header
LB: loop body
LE: loop exit
PB: predicated region body
PF: predicated region fallthrough
CT: control target
= control target key end

     0   :  { %11 = vsyncpa [#allocation3], 0  ;;  %s3417_s0 = inlined_call_operand.vmem [shape: f32[2,16,32], index: 0, kind: input, shape index: {}, may-alias: {0,4}]   ;;  %s3418_s1 = inlined_call_operand.hbm [shape: f32[64,128], index: 1, kind: input, shape index: {}]   ;;  %s3419_s2 = inlined_call_operand.vmem [shape: f32[4,128], index: 2, kind: input, shape index: {}]   ;;  %s3420_s3 = inlined_call_operand.hbm [shape: f32[128,32], index: 3, kind: input, shape index: {}]   ;;  %s3421_s4 = inlined_call_operand.vmem [shape: f32[2,16,32], index: 4, kind: output, shape index: {0}, may-alias: {0,4}]   ;;  %s3422_s5 = inlined_call_operand.hbm [shape: f32[64,8], index: 5, kind: output, shape index: {1}]  }
   0x1   :  { %12 = vsyncpa [#allocation6], 0 }
   0x2   :  { %13 = vsyncpa [#allocation4], 0  ;;  %s3009_s18 = smov [#allocation2]   ;;  %s2937_s22 = scalar_lea.hbm %s3418_s1, 1024 }
   0x3   :  { %s21_s19 = sshll.u32 %s3009_s18, 4  ;;  %p2938_p0 = scmp.ne.s32.totalorder %s3418_s1, %s2937_s22  ;;  %s22_s19 = int_to_ptr.vmem [resolvable:$true] %s21_s19 }
   0x4   :  { %p2941_p1 = scmp.lt.u32.totalorder %s2937_s22, %s3418_s1 }
   0x6   :  { %p2943_p2 = pnand %p2941_p1, %p2938_p0 }
   0x8   :  { %2946 = shalt.err (!%p2943_p2)
}
   0x9   :  { %s2947_s27 = scalar_lea.vmem %s22_s19, 1024  ;;  %p2952_p4 = scmp.lt.s32.totalorder %s22_s19, %s22_s19 }
   0xa   :  { %p2948_p3 = scmp.ne.s32.totalorder %s22_s19, %s2947_s27  ;;  %p2953_p5 = scmp.lt.s32.totalorder %s2947_s27, %s2947_s27 }
   0xc   :  { %p2954_p6 = por %p2953_p5, %p2952_p4 }
   0xe   :  { %p2955_p7 = pnand %p2954_p6, %p2948_p3 }
  0x10   :  { %2958 = shalt.err (!%p2955_p7)
}
  0x11   :  { %s3010_s28 = smov 128   ;;  %s3011_s29 = smov 8  }
  0x12   :  { %27 = dma.hbm_to_vmem [thread:$0]  %s3418_s1, 1024, %s22_s19, [#allocation3], %s3010_s28, %s3010_s28, %s3011_s29  }
  0x13   :  { %s3012_s7 = smov [#allocation5]   ;;  %s2959_s11 = scalar_lea.hbm %s3420_s3, 2048 }
  0x14   :  { %s35_s8 = sshll.u32 %s3012_s7, 4  ;;  %p2960_p8 = scmp.ne.s32.totalorder %s3420_s3, %s2959_s11  ;;  %s36_s8 = int_to_ptr.vmem [resolvable:$true] %s35_s8 }
  0x15   :  { %p2963_p9 = scmp.lt.u32.totalorder %s2959_s11, %s3420_s3 }
  0x17   :  { %p2965_p10 = pnand %p2963_p9, %p2960_p8 }
  0x19   :  { %2968 = shalt.err (!%p2965_p10)
}
  0x1a   :  { %s2969_s16 = scalar_lea.vmem %s36_s8, 2048  ;;  %p2974_p12 = scmp.lt.s32.totalorder %s36_s8, %s36_s8 }
  0x1b   :  { %p2970_p11 = scmp.ne.s32.totalorder %s36_s8, %s2969_s16  ;;  %p2975_p13 = scmp.lt.s32.totalorder %s2969_s16, %s2969_s16 }
  0x1d   :  { %p2976_p0 = por %p2975_p13, %p2974_p12 }
  0x1f   :  { %p2977_p1 = pnand %p2976_p0, %p2970_p11 }
  0x21   :  { %2980 = shalt.err (!%p2977_p1)
}
  0x22   :  { %41 = dma.hbm_to_vmem [thread:$0]  %s3420_s3, 2048, %s36_s8, [#allocation6], %s3010_s28, %s3010_s28, %s3011_s29  }
  0x23   :  { %3003 = dma.done.wait [#allocation3], 1024  }
  0x24   :  { %3004 = vsyncadd [#allocation3], 4294966272 }
  0x25   :  { %3005 = dma.done.wait [#allocation6], 2048  }
  0x26   :  { %3006 = vsyncadd [#allocation6], 4294965248  ;;  %vm62_vm0 = vcmask 261120   ;;  %v3085_v0 = vld [vmem:[#allocation2] sm:$0xff]  ;;  %v3087_v1 = vld [vmem:[#allocation2 + $0x8] sm:$0xff]  ;;  %s3013_s25 = smov 64   ;;  %v58_v20 = vlaneseq }
  0x27   :  { %v3089_v2 = vld [vmem:[#allocation2 + $0x10] sm:$0xff]  ;;  %v2815_v3 = vpack.c.bf16 %v3087_v1, %v3085_v0  ;;  %v3093_v4 = vld [vmem:[#allocation2 + $0x18] sm:$0xff]  ;;  %v2887_v7 = vpack.i.bf16 %v3087_v1, %v3085_v0  ;;  %v3014_v11 = vmov 0.0   ;;  %vm3015_vm1 = vmmov 0   ;;  %v3145_v24 = vld [vmem:[%s3419_s2] sm:$0xf] }
  0x28   :  { %v2501_v5 = vld [vmem:[%s3417_s0 + $0x10] sm:$0xff]  ;;  %v2502_v6 = vld [vmem:[%s3417_s0 + $0x18] sm:$0xff]  ;;  %v2819_v8 = vpack.c.bf16 %v3093_v4, %v3089_v2  ;;  %v2892_v9 = vpack.i.bf16 %v3093_v4, %v3089_v2  ;;  %2664 = vmatprep.subr.mxu1 %v3014_v11  ;;  %v3135_v22 = vshrl.u32 %v58_v20, 7  ;;  %2666 = vmatprep.mubr.msk.f32.mxu1 %vm3015_vm1, %v3014_v11  ;;  %vm248_vm2 = vcmask 64512   ;;  %s3017_s2 = smov 88   ;;  %s3018_s9 = smov 120  }
  0x29   :  { %2635 = vmatprep.mubr.msk.f32.mxu0 %vm62_vm0, %v2501_v5  ;;  %2541 = vst.msk [vmem:[%s3421_s4 + $0x10] sm:$0xff] %vm62_vm0, %v2501_v5  ;;  %2542 = vst.msk [vmem:[%s3421_s4 + $0x18] sm:$0xff] %vm62_vm0, %v2502_v6  ;;  %2816 = vmatprep.subr.bf16.mxu0 %v2815_v3  ;;  %s3019_s10 = smov 80   ;;  %s3020_s11 = smov 32  }
  0x2a   :  { %2888 = vrot.lane.b32.xlu0 %v2887_v7, %s3013_s25  ;;  %2818 = vmatpush3.bf16.msra.mxu0 %v2815_v3  ;;  %v60_v23 = vsub.s32 0, %v3135_v22  ;;  %s3021_s12 = smov 112   ;;  %s3022_s13 = smov 72  }
  0x2b   :  { %2820 = vmatprep.subr.bf16.mxu0 %v2819_v8  ;;  %s3023_s14 = smov 104   ;;  %s3024_s15 = smov [#allocation7]  }
  0x2c   :  { %v3148_v25 = vrot.slane %v3145_v24, %v60_v23  ;;  %s2486_s16 = sshll.u32 %s3024_s15, 4  ;;  %s2487_s16 = int_to_ptr.vmem [resolvable:$true] %s2486_s16 }
  0x2d   :  { %s2981_s1 = scalar_lea.vmem %s2487_s16, 1024  ;;  %p2986_p3 = scmp.lt.s32.totalorder %s2487_s16, %s2487_s16 }
  0x2e   :  { %2893 = vrot.lane.b32.xlu0 %v2892_v9, %s3013_s25  ;;  %2822 = vmatpush3.bf16.msra.mxu0 %v2819_v8  ;;  %p2982_p2 = scmp.ne.s32.totalorder %s2487_s16, %s2981_s1  ;;  %p2987_p4 = scmp.lt.s32.totalorder %s2981_s1, %s2981_s1 }
  0x30   :  { %v3122_v10 = vld [vmem:[%s3417_s0] sm:$0xff]  ;;  %v3131_v21 = vld [vmem:[%s3417_s0 + $0x8] sm:$0xff]  ;;  %s3016_s0 = smov 96   ;;  %p2988_p5 = por %p2987_p4, %p2986_p3 }
  0x31   :  { %2636 = vmatmul.mubr.msk.f32.vlgmr.msra.gmra.mrb[0].mxu0 %vm62_vm0, %v2502_v6 }
  0x32   :  { %2646 = vmatprep.mubr.msk.f32.mxu0 %vm62_vm0, %v3122_v10  ;;  %p2989_p6 = pnand %p2988_p5, %p2982_p2 }
  0x9c   :  { %v2889_v12 = vpop.permute.xlu0 %2888 }
  0x9d   :  { %v2891_v13 = vunpack.i.h.bf16 %v2889_v12  ;;  %v2890_v14 = vunpack.i.l.bf16 %v2889_v12 }
  0x9f   :  { %v2823_v15 = vpack.c.bf16 %v2891_v13, %v2890_v14 }
  0xa0   :  { %v2894_v16 = vpop.permute.xlu0 %2893 }
  0xa1   :  { %v2896_v17 = vunpack.i.h.bf16 %v2894_v16  ;;  %v2895_v18 = vunpack.i.l.bf16 %v2894_v16  ;;  %2824 = vmatprep.subr.bf16.mxu0 %v2823_v15 }
  0xa2   :  { %2826 = vmatpush3.bf16.msra.mxu0 %v2823_v15 }
  0xa3   :  { %v2827_v19 = vpack.c.bf16 %v2896_v17, %v2895_v18 }
  0xa5   :  { %2828 = vmatprep.subr.bf16.mxu0 %v2827_v19 }
  0xa6   :  { %2830 = vmatpush3.bf16.msra.mxu0 %v2827_v19 }
  0xa7   :  { %2649 = vmatprep.subr.mxu0 %v3014_v11 }
  0xa9   :  { %2647 = vmatmul.mubr.msk.f32.vlgmr.msra.gmra.mrb[2].mxu0 %vm62_vm0, %v3131_v21 }
  0xaa   :  { %2651 = vmatprep.mubr.msk.f32.mxu0 %vm3015_vm1, %v3014_v11 }
 0x104   :  { %v3150_v26 = vpop.f32.mrb[0].mxu0 }
 0x105   :  { %v135_v27 = vpop.f32.mrb[1].mxu0 }
 0x106   :  { %v3153_v28 = vadd.f32 %v135_v27, %v3148_v25 }
 0x108   :  { %246 = vrot.lane.b32.xlu1 %v3153_v28, %s3016_s0 }
 0x17a   :  { %v247_v29 = vpop.permute.xlu1 %246 }
 0x17b   :  { %2650 = vmatpush3.xpose.msk.msra.mxu0 %vm248_vm2, %v247_v29 }
 0x17c   :  { %2654 = vmatprep.subr.mxu0 %v3014_v11  ;;  %v3163_v30 = vpop.f32.mrb[2].mxu0 }
 0x17d   :  { %v236_v31 = vpop.f32.mrb[3].mxu0 }
 0x17e   :  { %2652 = vmatmul.mubr.msk.f32.vlgmr.msra.gmra.mrb[4].mxu0 %vm248_vm2, %v3153_v28 }
 0x17f   :  { %2656 = vmatprep.mubr.msk.f32.mxu0 %vm3015_vm1, %v3014_v11 }
 0x251   :  { %v319_v32 = vpop.f32.mrb[4].mxu0 }
 0x252   :  { %v323_v33 = vmul.f32 0.35355338, %v319_v32  ;;  %v2653_v34 = vpop.f32.mrb[5].mxu0 }
 0x254   :  { %v324_v35 = vsel %vm248_vm2, %v323_v33, -inf }
 0x255   :  { %325 = vmax.xlane.f32.xlu1 %v324_v35 }
 0x266   :  { %412 = vrot.lane.b32.xlu1 %v3153_v28, %s3017_s2 }
 0x26a   :  { %410 = vrot.lane.b32.xlu1 %v3153_v28, %s3018_s9 }
 0x2e2   :  { %v326_v36 = vpop.xlane.xlu1 %325 }
 0x2e3   :  { %v327_v37 = vsub.f32 %v323_v33, %v326_v36 }
 0x2e5   :  { %v328_v38 = vmul.f32 1.442695, %v327_v37 }
 0x2e6   :  { %v413_v45 = vpop.permute.xlu1 %412 }
 0x2e7   :  { %2897 = vpow2.f32 %v328_v38 }
 0x2ea   :  { %v411_v47 = vpop.permute.xlu1 %410 }
 0x2f1   :  { %v2898_v39 = vpop.eup %2897 }
 0x2f2   :  { %v330_v40 = vsel %vm248_vm2, %v2898_v39, 0.0 }
 0x2f3   :  { %331 = vadd.xlane.f32.xlu0 %v330_v40 }
 0x309   :  { %161 = vrot.lane.b32.xlu0 %v3148_v25, %s3013_s25 }
 0x380   :  { %v332_v41 = vpop.xlane.xlu0 %331 }
 0x381   :  { %2899 = vrcp.f32 %v332_v41 }
 0x384   :  { %v3173_v42 = vpop.permute.xlu0 %161 }
 0x385   :  { %v3176_v43 = vadd.f32 %v236_v31, %v3173_v42 }
 0x387   :  { %2655 = vmatpush3.msra.mxu0 %v3176_v43 }
 0x388   :  { %2659 = vmatprep.subr.mxu0 %v3014_v11 }
 0x38b   :  { %v2900_v44 = vpop.eup %2899 }
 0x38c   :  { %v334_v46 = vmul.f32 %v2900_v44, %v2898_v39  ;;  %v3244_v44 = vadd.f32 %v3150_v26, %v3148_v25 }
 0x38e   :  { %335 = vst.msk [vmem:[#allocation7] sm:$0xff] %vm248_vm2, %v334_v46  ;;  %2657 = vmatmul.mubr.msk.f32.vlgmr.msra.gmra.mrb[6].mxu0 %vm248_vm2, %v334_v46 }
 0x38f   :  { %2660 = vmatpush3.xpose.msk.msra.mxu0 %vm248_vm2, %v413_v45  ;;  %2661 = vmatprep.mubr.msk.f32.mxu0 %vm3015_vm1, %v3014_v11 }
 0x390   :  { %2669 = vmatprep.subr.mxu0 %v3014_v11 }
 0x392   :  { %2662 = vmatmul.mubr.msk.f32.vlgmr.msra.gmra.mrb[8].mxu0 %vm248_vm2, %v411_v47 }
 0x393   :  { %2671 = vmatprep.mubr.msk.f32.mxu0 %vm3015_vm1, %v3014_v11 }
 0x461   :  { %v405_v48 = vpop.f32.mrb[6].mxu0 }
 0x462   :  { %v2658_v49 = vpop.f32.mrb[7].mxu0 }
 0x465   :  { %v484_v50 = vpop.f32.mrb[8].mxu0 }
 0x466   :  { %v488_v51 = vmul.f32 0.35355338, %v484_v50  ;;  %v2663_v52 = vpop.f32.mrb[9].mxu0 }
 0x468   :  { %v489_v53 = vsel %vm248_vm2, %v488_v51, -inf }
 0x469   :  { %490 = vmax.xlane.f32.xlu0 %v489_v53 }
 0x47f   :  { %502 = vrot.lane.b32.xlu0 %v3176_v43, %s3018_s9 }
 0x483   :  { %735 = vrot.lane.b32.xlu0 %v3153_v28, %s3019_s10 }
 0x4f6   :  { %v491_v54 = vpop.xlane.xlu0 %490 }
 0x4f7   :  { %v492_v55 = vsub.f32 %v488_v51, %v491_v54 }
 0x4f9   :  { %v493_v56 = vmul.f32 1.442695, %v492_v55 }
 0x4fa   :  { %v503_v57 = vpop.permute.xlu0 %502 }
 0x4fb   :  { %2901 = vpow2.f32 %v493_v56  ;;  %2665 = vmatpush3.msra.mxu1 %v503_v57 }
 0x4fc   :  { %2674 = vmatprep.subr.mxu1 %v3014_v11 }
 0x4fe   :  { %v736_v5 = vpop.permute.xlu0 %735 }
 0x505   :  { %v2902_v58 = vpop.eup %2901 }
 0x506   :  { %v495_v59 = vsel %vm248_vm2, %v2902_v58, 0.0 }
 0x507   :  { %496 = vadd.xlane.f32.xlu1 %v495_v59 }
 0x518   :  { %580 = vrot.lane.b32.xlu1 %v3087_v1, %s3020_s11 }
 0x51c   :  { %733 = vrot.lane.b32.xlu1 %v3153_v28, %s3021_s12 }
 0x520   :  { %824 = vrot.lane.b32.xlu1 %v3176_v43, %s3021_s12 }
 0x594   :  { %v497_v60 = vpop.xlane.xlu1 %496 }
 0x595   :  { %2903 = vrcp.f32 %v497_v60 }
 0x598   :  { %v581_v61 = vpop.permute.xlu1 %580 }
 0x599   :  { %2670 = vmatpush3.msra.mxu0 %v581_v61 }
 0x59a   :  { %2679 = vmatprep.subr.mxu0 %v3014_v11 }
 0x59c   :  { %v734_v7 = vpop.permute.xlu1 %733 }
 0x59f   :  { %v2904_v62 = vpop.eup %2903 }
 0x5a0   :  { %v499_v63 = vmul.f32 %v2904_v62, %v2902_v58  ;;  %v825_v20 = vpop.permute.xlu1 %824 }
 0x5a2   :  { %500 = vst.msk [vmem:[#allocation7 + $0x8] sm:$0xff] %vm248_vm2, %v499_v63  ;;  %2667 = vmatmul.mubr.msk.f32.vlgmr.msra.gmra.mrb[0].mxu1 %vm248_vm2, %v499_v63 }
 0x5a3   :  { %2676 = vmatprep.mubr.msk.f32.mxu1 %vm3015_vm1, %v3014_v11 }
 0x675   :  { %v574_v3 = vpop.f32.mrb[0].mxu1 }
 0x676   :  { %v2668_v6 = vpop.f32.mrb[1].mxu1  ;;  %2672 = vmatmul.mubr.msk.f32.vlgmr.msra.gmra.mrb[10].mxu0 %vm248_vm2, %v574_v3 }
 0x677   :  { %2680 = vmatpush3.xpose.msk.msra.mxu0 %vm248_vm2, %v736_v5  ;;  %2681 = vmatprep.mubr.msk.f32.mxu0 %vm3015_vm1, %v3014_v11 }
 0x678   :  { %2689 = vmatprep.subr.mxu0 %v3014_v11 }
 0x67a   :  { %2682 = vmatmul.mubr.msk.f32.vlgmr.msra.gmra.mrb[12].mxu0 %vm248_vm2, %v734_v7 }
 0x67b   :  { %2691 = vmatprep.mubr.msk.f32.mxu0 %vm3015_vm1, %v3014_v11 }
 0x749   :  { %v652_v8 = vpop.f32.mrb[10].mxu0 }
 0x74a   :  { %v2673_v9 = vpop.f32.mrb[11].mxu0 }
 0x74d   :  { %v807_v12 = vpop.f32.mrb[12].mxu0 }
 0x74e   :  { %v811_v13 = vmul.f32 0.35355338, %v807_v12  ;;  %v2683_v14 = vpop.f32.mrb[13].mxu0 }
 0x750   :  { %v812_v15 = vsel %vm248_vm2, %v811_v13, -inf }
 0x751   :  { %813 = vmax.xlane.f32.xlu0 %v812_v15 }
 0x767   :  { %657 = vrot.lane.b32.xlu0 %v3085_v0, %s3020_s11 }
 0x76b   :  { %981 = vrot.lane.b32.xlu0 %v3153_v28, %s3022_s13 }
 0x7de   :  { %v814_v16 = vpop.xlane.xlu0 %813 }
 0x7df   :  { %v815_v17 = vsub.f32 %v811_v13, %v814_v16 }
 0x7e1   :  { %v816_v18 = vmul.f32 1.442695, %v815_v17 }
 0x7e2   :  { %v658_v19 = vpop.permute.xlu0 %657 }
 0x7e3   :  { %2905 = vpow2.f32 %v816_v18  ;;  %2675 = vmatpush3.msra.mxu1 %v658_v19 }
 0x7e4   :  { %2677 = vmatmul.mubr.msk.f32.vlgmr.msra.gmra.mrb[2].mxu1 %vm248_vm2, %v405_v48  ;;  %2684 = vmatprep.subr.mxu1 %v3014_v11 }
 0x7e5   :  { %2685 = vmatpush3.msra.mxu1 %v825_v20  ;;  %2686 = vmatprep.mubr.msk.f32.mxu1 %vm3015_vm1, %v3014_v11 }
 0x7e6   :  { %2694 = vmatprep.subr.mxu1 %v3014_v11  ;;  %v982_v33 = vpop.permute.xlu0 %981 }
 0x7ed   :  { %v2906_v23 = vpop.eup %2905 }
 0x7ee   :  { %v818_v27 = vsel %vm248_vm2, %v2906_v23, 0.0 }
 0x7ef   :  { %819 = vadd.xlane.f32.xlu1 %v818_v27  ;;  %v3281_v27 = vadd.f32 %v3163_v30, %v3173_v42 }
 0x800   :  { %979 = vrot.lane.b32.xlu1 %v3153_v28, %s3023_s14 }
 0x804   :  { %1070 = vrot.lane.b32.xlu1 %v3176_v43, %s3023_s14 }
 0x87c   :  { %v820_v29 = vpop.xlane.xlu1 %819 }
 0x87d   :  { %2907 = vrcp.f32 %v820_v29 }
 0x880   :  { %v980_v28 = vpop.permute.xlu1 %979 }
 0x884   :  { %v1071_v49 = vpop.permute.xlu1 %1070 }
 0x887   :  { %v2908_v31 = vpop.eup %2907 }
 0x888   :  { %v822_v32 = vmul.f32 %v2908_v31, %v2906_v23 }
 0x88a   :  { %823 = vst.msk [vmem:[#allocation7 + $0x10] sm:$0xff] %vm248_vm2, %v822_v32  ;;  %2687 = vmatmul.mubr.msk.f32.vlgmr.msra.gmra.mrb[4].mxu1 %vm248_vm2, %v822_v32 }
 0x88b   :  { %2695 = vmatpush3.xpose.msk.msra.mxu1 %vm248_vm2, %v982_v33  ;;  %2696 = vmatprep.mubr.msk.f32.mxu1 %vm3015_vm1, %v3014_v11 }
 0x88c   :  { %2704 = vmatprep.subr.mxu1 %v3014_v11 }
 0x88e   :  { %2697 = vmatmul.mubr.msk.f32.vlgmr.msra.gmra.mrb[6].mxu1 %vm248_vm2, %v980_v28 }
 0x88f   :  { %2706 = vmatprep.mubr.msk.f32.mxu1 %vm3015_vm1, %v3014_v11 }
 0x8b7   :  { %v729_v34 = vpop.f32.mrb[2].mxu1 }
 0x8b8   :  { %v730_v35 = vadd.f32 %v729_v34, %v652_v8  ;;  %v2678_v36 = vpop.f32.mrb[3].mxu1 }
 0x95d   :  { %v896_v37 = vpop.f32.mrb[4].mxu1 }
 0x95e   :  { %v2688_v38 = vpop.f32.mrb[5].mxu1 }
 0x961   :  { %v1053_v39 = vpop.f32.mrb[6].mxu1 }
 0x962   :  { %v1057_v40 = vmul.f32 0.35355338, %v1053_v39  ;;  %v2698_v41 = vpop.f32.mrb[7].mxu1 }
 0x964   :  { %v1058_v43 = vsel %vm248_vm2, %v1057_v40, -inf }
 0x965   :  { %1059 = vmax.xlane.f32.xlu0 %v1058_v43 }
 0x97b   :  { %902 = vrot.lane.b32.xlu0 %v3089_v2, %s3020_s11 }
 0x97f   :  { %1226 = vrot.lane.b32.xlu0 %v3244_v44, %s3016_s0 }
 0x983   :  { %1389 = vrot.lane.b32.xlu0 %v3244_v44, %s3018_s9 }
 0x9f2   :  { %v1060_v45 = vpop.xlane.xlu0 %1059 }
 0x9f3   :  { %v1061_v46 = vsub.f32 %v1057_v40, %v1060_v45 }
 0x9f5   :  { %v1062_v47 = vmul.f32 1.442695, %v1061_v46 }
 0x9f6   :  { %v903_v48 = vpop.permute.xlu0 %902 }
 0x9f7   :  { %2909 = vpow2.f32 %v1062_v47  ;;  %2690 = vmatpush3.msra.mxu0 %v903_v48 }
 0x9f8   :  { %2692 = vmatmul.mubr.msk.f32.vlgmr.msra.gmra.mrb[14].mxu0 %vm248_vm2, %v896_v37  ;;  %2699 = vmatprep.subr.mxu0 %v3014_v11 }
 0x9f9   :  { %2700 = vmatpush3.msra.mxu0 %v1071_v49  ;;  %2701 = vmatprep.mubr.msk.f32.mxu0 %vm3015_vm1, %v3014_v11 }
 0x9fa   :  { %2709 = vmatprep.subr.mxu0 %v3014_v11  ;;  %v1227_v54 = vpop.permute.xlu0 %1226 }
 0x9fe   :  { %v1390_v56 = vpop.permute.xlu0 %1389 }
 0xa01   :  { %v2910_v26 = vpop.eup %2909 }
 0xa02   :  { %v1064_v50 = vsel %vm248_vm2, %v2910_v26, 0.0 }
 0xa03   :  { %1065 = vadd.xlane.f32.xlu1 %v1064_v50 }
 0xa14   :  { %1391 = vrot.lane.b32.xlu1 %v3244_v44, %s3017_s2 }
 0xa90   :  { %v1066_v51 = vpop.xlane.xlu1 %1065 }
 0xa91   :  { %2911 = vrcp.f32 %v1066_v51 }
 0xa94   :  { %v1392_v55 = vpop.permute.xlu1 %1391 }
 0xa9b   :  { %v2912_v52 = vpop.eup %2911 }
 0xa9c   :  { %v1068_v53 = vmul.f32 %v2912_v52, %v2910_v26 }
 0xa9e   :  { %1069 = vst.msk [vmem:[#allocation7 + $0x18] sm:$0xff] %vm248_vm2, %v1068_v53  ;;  %2702 = vmatmul.mubr.msk.f32.vlgmr.msra.gmra.mrb[16].mxu0 %vm248_vm2, %v1068_v53 }
 0xa9f   :  { %2710 = vmatpush3.xpose.msk.msra.mxu0 %vm248_vm2, %v1227_v54  ;;  %2711 = vmatprep.mubr.msk.f32.mxu0 %vm3015_vm1, %v3014_v11 }
 0xaa0   :  { %2719 = vmatprep.subr.mxu0 %v3014_v11 }
 0xaa2   :  { %2712 = vmatmul.mubr.msk.f32.vlgmr.msra.gmra.mrb[18].mxu0 %vm248_vm2, %v3244_v44 }
 0xaa3   :  { %2720 = vmatpush3.xpose.msk.msra.mxu0 %vm248_vm2, %v1392_v55  ;;  %2721 = vmatprep.mubr.msk.f32.mxu0 %vm3015_vm1, %v3014_v11 }
 0xaa4   :  { %2729 = vmatprep.subr.mxu0 %v3014_v11 }
 0xaa6   :  { %2722 = vmatmul.mubr.msk.f32.vlgmr.msra.gmra.mrb[20].mxu0 %vm248_vm2, %v1390_v56 }
 0xaa7   :  { %2731 = vmatprep.mubr.msk.f32.mxu0 %vm3015_vm1, %v3014_v11 }
 0xacb   :  { %v974_v57 = vpop.f32.mrb[14].mxu0 }
 0xacc   :  { %v3273_v58 = vadd.f32 %v974_v57, %v730_v35  ;;  %v2693_v59 = vpop.f32.mrb[15].mxu0 }
 0xb71   :  { %v1142_v60 = vpop.f32.mrb[16].mxu0 }
 0xb72   :  { %v2703_v61 = vpop.f32.mrb[17].mxu0 }
 0xb75   :  { %v1298_v62 = vpop.f32.mrb[18].mxu0 }
 0xb76   :  { %v1302_v63 = vmul.f32 0.35355338, %v1298_v62  ;;  %v2713_v3 = vpop.f32.mrb[19].mxu0 }
 0xb78   :  { %v1303_v5 = vsel %vm248_vm2, %v1302_v63, -inf }
 0xb79   :  { %1304 = vmax.xlane.f32.xlu1 %v1303_v5  ;;  %v1463_v6 = vpop.f32.mrb[20].mxu0 }
 0xb7a   :  { %v1467_v7 = vmul.f32 0.35355338, %v1463_v6  ;;  %v2723_v8 = vpop.f32.mrb[21].mxu0 }
 0xb7c   :  { %v1468_v9 = vsel %vm248_vm2, %v1467_v7, -inf }
 0xb7d   :  { %1469 = vmax.xlane.f32.xlu0 %v1468_v9 }
 0xc06   :  { %v1305_v12 = vpop.xlane.xlu1 %1304 }
 0xc07   :  { %v1306_v13 = vsub.f32 %v1302_v63, %v1305_v12 }
 0xc09   :  { %v1307_v14 = vmul.f32 1.442695, %v1306_v13 }
 0xc0a   :  { %v1470_v15 = vpop.xlane.xlu0 %1469 }
 0xc0b   :  { %2913 = vpow2.f32 %v1307_v14  ;;  %v1471_v16 = vsub.f32 %v1467_v7, %v1470_v15 }
 0xc0d   :  { %v1472_v17 = vmul.f32 1.442695, %v1471_v16 }
 0xc0f   :  { %2915 = vpow2.f32 %v1472_v17 }
 0xc15   :  { %v2914_v18 = vpop.eup %2913 }
 0xc16   :  { %v1309_v19 = vsel %vm248_vm2, %v2914_v18, 0.0 }
 0xc17   :  { %1310 = vadd.xlane.f32.xlu0 %v1309_v19 }
 0xc19   :  { %v2916_v20 = vpop.eup %2915 }
 0xc1a   :  { %v1474_v23 = vsel %vm248_vm2, %v2916_v20, 0.0 }
 0xc1b   :  { %1475 = vadd.xlane.f32.xlu1 %v1474_v23 }
 0xc2c   :  { %1481 = vrot.lane.b32.xlu1 %v3281_v27, %s3018_s9 }
 0xc2d   :  { %1148 = vrot.lane.b32.xlu0 %v3093_v4, %s3020_s11 }
 0xc30   :  { %1559 = vrot.lane.b32.xlu1 %v3087_v1, %s3020_s11 }
 0xc31   :  { %1714 = vrot.lane.b32.xlu0 %v3244_v44, %s3019_s10 }
 0xc34   :  { %1712 = vrot.lane.b32.xlu1 %v3244_v44, %s3021_s12 }
 0xc38   :  { %1803 = vrot.lane.b32.xlu1 %v3281_v27, %s3021_s12 }
 0xca4   :  { %v1311_v30 = vpop.xlane.xlu0 %1310 }
 0xca5   :  { %2917 = vrcp.f32 %v1311_v30 }
 0xca8   :  { %v1476_v42 = vpop.xlane.xlu1 %1475  ;;  %v1149_v29 = vpop.permute.xlu0 %1148 }
 0xca9   :  { %2919 = vrcp.f32 %v1476_v42  ;;  %2705 = vmatpush3.msra.mxu1 %v1149_v29 }
 0xcaa   :  { %2707 = vmatmul.mubr.msk.f32.vlgmr.msra.gmra.mrb[8].mxu1 %vm248_vm2, %v1142_v60  ;;  %2714 = vmatprep.subr.mxu1 %v3014_v11 }
 0xcab   :  { %2715 = vmatpush3.msra.mxu1 %v3281_v27  ;;  %2716 = vmatprep.mubr.msk.f32.mxu1 %vm3015_vm1, %v3014_v11 }
 0xcac   :  { %v1482_v1 = vpop.permute.xlu1 %1481  ;;  %2724 = vmatprep.subr.mxu1 %v3014_v11  ;;  %v1715_v41 = vpop.permute.xlu0 %1714 }
 0xcaf   :  { %v2918_v31 = vpop.eup %2917 }
 0xcb0   :  { %v1313_v32 = vmul.f32 %v2918_v31, %v2914_v18  ;;  %v1560_v33 = vpop.permute.xlu1 %1559 }
 0xcb1   :  { %2730 = vmatpush3.msra.mxu0 %v1560_v33 }
 0xcb2   :  { %1314 = vst.msk [vmem:[#allocation7 + $0x20] sm:$0xff] %vm248_vm2, %v1313_v32  ;;  %2717 = vmatmul.mubr.msk.f32.vlgmr.msra.gmra.mrb[10].mxu1 %vm248_vm2, %v1313_v32  ;;  %2739 = vmatprep.subr.mxu0 %v3014_v11 }
 0xcb3   :  { %v2920_v28 = vpop.eup %2919  ;;  %2725 = vmatpush3.msra.mxu1 %v1482_v1  ;;  %2726 = vmatprep.mubr.msk.f32.mxu1 %vm3015_vm1, %v3014_v11 }
 0xcb4   :  { %v1478_v34 = vmul.f32 %v2920_v28, %v2916_v20  ;;  %2734 = vmatprep.subr.mxu1 %v3014_v11  ;;  %v1713_v45 = vpop.permute.xlu1 %1712 }
 0xcb6   :  { %1479 = vst.msk [vmem:[#allocation7 + $0x28] sm:$0xff] %vm248_vm2, %v1478_v34  ;;  %2727 = vmatmul.mubr.msk.f32.vlgmr.msra.gmra.mrb[12].mxu1 %vm248_vm2, %v1478_v34 }
 0xcb7   :  { %2736 = vmatprep.mubr.msk.f32.mxu1 %vm3015_vm1, %v3014_v11 }
 0xcb8   :  { %v1804_v55 = vpop.permute.xlu1 %1803 }
 0xd7d   :  { %v1220_v35 = vpop.f32.mrb[8].mxu1 }
 0xd7e   :  { %v3312_v36 = vadd.f32 %v1220_v35, %v3273_v58  ;;  %v2708_v37 = vpop.f32.mrb[9].mxu1 }
 0xd80   :  { %v2204_v19 = vadd.f32 %v3312_v36, %v3122_v10 }
 0xd85   :  { %v1384_v38 = vpop.f32.mrb[10].mxu1 }
 0xd86   :  { %v2718_v39 = vpop.f32.mrb[11].mxu1 }
 0xd89   :  { %v1553_v40 = vpop.f32.mrb[12].mxu1 }
 0xd8a   :  { %v2728_v43 = vpop.f32.mrb[13].mxu1  ;;  %2732 = vmatmul.mubr.msk.f32.vlgmr.msra.gmra.mrb[22].mxu0 %vm248_vm2, %v1553_v40 }
 0xd8b   :  { %2740 = vmatpush3.xpose.msk.msra.mxu0 %vm248_vm2, %v1715_v41  ;;  %2741 = vmatprep.mubr.msk.f32.mxu0 %vm3015_vm1, %v3014_v11  ;;  %v2240_v41 = vsub.s32 2, %v3135_v22 }
 0xd8c   :  { %2749 = vmatprep.subr.mxu0 %v3014_v11 }
 0xd8d   :  { %v3369_v43 = vrot.slane %v3145_v24, %v2240_v41 }
 0xd8e   :  { %2742 = vmatmul.mubr.msk.f32.vlgmr.msra.gmra.mrb[24].mxu0 %vm248_vm2, %v1713_v45 }
 0xd8f   :  { %2751 = vmatprep.mubr.msk.f32.mxu0 %vm3015_vm1, %v3014_v11 }
 0xe5d   :  { %v1631_v46 = vpop.f32.mrb[22].mxu0 }
 0xe5e   :  { %v2733_v47 = vpop.f32.mrb[23].mxu0 }
 0xe61   :  { %v1786_v48 = vpop.f32.mrb[24].mxu0 }
 0xe62   :  { %v1790_v49 = vmul.f32 0.35355338, %v1786_v48  ;;  %v2743_v26 = vpop.f32.mrb[25].mxu0 }
 0xe64   :  { %v1791_v50 = vsel %vm248_vm2, %v1790_v49, -inf }
 0xe65   :  { %1792 = vmax.xlane.f32.xlu0 %v1791_v50 }
 0xe7b   :  { %1636 = vrot.lane.b32.xlu0 %v3085_v0, %s3020_s11 }
 0xe7f   :  { %1960 = vrot.lane.b32.xlu0 %v3244_v44, %s3022_s13 }
 0xef2   :  { %v1793_v51 = vpop.xlane.xlu0 %1792 }
 0xef3   :  { %v1794_v52 = vsub.f32 %v1790_v49, %v1793_v51 }
 0xef5   :  { %v1795_v53 = vmul.f32 1.442695, %v1794_v52 }
 0xef6   :  { %v1637_v54 = vpop.permute.xlu0 %1636 }
 0xef7   :  { %2921 = vpow2.f32 %v1795_v53  ;;  %2735 = vmatpush3.msra.mxu1 %v1637_v54 }
 0xef8   :  { %2737 = vmatmul.mubr.msk.f32.vlgmr.msra.gmra.mrb[14].mxu1 %vm248_vm2, %v1384_v38  ;;  %2744 = vmatprep.subr.mxu1 %v3014_v11 }
 0xef9   :  { %2745 = vmatpush3.msra.mxu1 %v1804_v55  ;;  %2746 = vmatprep.mubr.msk.f32.mxu1 %vm3015_vm1, %v3014_v11 }
 0xefa   :  { %2754 = vmatprep.subr.mxu1 %v3014_v11  ;;  %v1961_v60 = vpop.permute.xlu0 %1960 }
 0xf01   :  { %v2922_v0 = vpop.eup %2921 }
 0xf02   :  { %v1797_v56 = vsel %vm248_vm2, %v2922_v0, 0.0 }
 0xf03   :  { %1798 = vadd.xlane.f32.xlu1 %v1797_v56  ;;  %v2251_v56 = vld [vmem:[#allocation2 + $0x28] sm:$0xff] }
 0xf14   :  { %1958 = vrot.lane.b32.xlu1 %v3244_v44, %s3023_s14 }
 0xf90   :  { %v1799_v57 = vpop.xlane.xlu1 %1798 }
 0xf91   :  { %2923 = vrcp.f32 %v1799_v57 }
 0xf94   :  { %v1959_v61 = vpop.permute.xlu1 %1958 }
 0xf9b   :  { %v2924_v58 = vpop.eup %2923 }
 0xf9c   :  { %v1801_v59 = vmul.f32 %v2924_v58, %v2922_v0  ;;  %v2250_v0 = vld [vmem:[#allocation2 + $0x20] sm:$0xff]  ;;  %v2252_v58 = vld [vmem:[#allocation2 + $0x30] sm:$0xff] }
 0xf9d   :  { %v2831_v57 = vpack.c.bf16 %v2251_v56, %v2250_v0 }
 0xf9e   :  { %1802 = vst.msk [vmem:[#allocation7 + $0x30] sm:$0xff] %vm248_vm2, %v1801_v59  ;;  %2747 = vmatmul.mubr.msk.f32.vlgmr.msra.gmra.mrb[16].mxu1 %vm248_vm2, %v1801_v59  ;;  %v2253_v59 = vld [vmem:[#allocation2 + $0x38] sm:$0xff] }
 0xf9f   :  { %2755 = vmatpush3.xpose.msk.msra.mxu1 %vm248_vm2, %v1961_v60  ;;  %2756 = vmatprep.mubr.msk.f32.mxu1 %vm3015_vm1, %v3014_v11  ;;  %v2835_v60 = vpack.c.bf16 %v2253_v59, %v2252_v58 }
 0xfa0   :  { %2764 = vmatprep.subr.mxu1 %v3014_v11 }
 0xfa2   :  { %2757 = vmatmul.mubr.msk.f32.vlgmr.msra.gmra.mrb[18].mxu1 %vm248_vm2, %v1959_v61  ;;  %v2341_v61 = vld [vmem:[#allocation5] sm:$0xff] }
 0xfa3   :  { %2766 = vmatprep.mubr.msk.f32.mxu1 %vm3015_vm1, %v3014_v11 }
 0xfcb   :  { %v1708_v44 = vpop.f32.mrb[14].mxu1 }
 0xfcc   :  { %v1709_v62 = vadd.f32 %v1708_v44, %v1631_v46  ;;  %v2738_v63 = vpop.f32.mrb[15].mxu1  ;;  %v2342_v44 = vld [vmem:[#allocation5 + $0x8] sm:$0xff] }
 0xfcd   :  { %v2839_v63 = vpack.c.bf16 %v2342_v44, %v2341_v61 }
0x1071   :  { %v1875_v3 = vpop.f32.mrb[16].mxu1 }
0x1072   :  { %v2748_v5 = vpop.f32.mrb[17].mxu1 }
0x1075   :  { %v2032_v6 = vpop.f32.mrb[18].mxu1 }
0x1076   :  { %v2036_v7 = vmul.f32 0.35355338, %v2032_v6  ;;  %v2758_v8 = vpop.f32.mrb[19].mxu1  ;;  %v2345_v6 = vld [vmem:[#allocation5 + $0x20] sm:$0xff] }
0x1078   :  { %v2037_v9 = vsel %vm248_vm2, %v2036_v7, -inf }
0x1079   :  { %2038 = vmax.xlane.f32.xlu0 %v2037_v9  ;;  %v2347_v9 = vld [vmem:[#allocation5 + $0x30] sm:$0xff] }
0x108f   :  { %1881 = vrot.lane.b32.xlu0 %v3089_v2, %s3020_s11 }
0x1093   :  { %2127 = vrot.lane.b32.xlu0 %v3093_v4, %s3020_s11 }
0x1106   :  { %v2039_v12 = vpop.xlane.xlu0 %2038 }
0x1107   :  { %v2040_v13 = vsub.f32 %v2036_v7, %v2039_v12  ;;  %v2346_v7 = vld [vmem:[#allocation5 + $0x28] sm:$0xff]  ;;  %v2348_v12 = vld [vmem:[#allocation5 + $0x38] sm:$0xff] }
0x1108   :  { %v2847_v8 = vpack.c.bf16 %v2346_v7, %v2345_v6 }
0x1109   :  { %v2041_v14 = vmul.f32 1.442695, %v2040_v13  ;;  %v2851_v13 = vpack.c.bf16 %v2348_v12, %v2347_v9 }
0x110a   :  { %v1882_v15 = vpop.permute.xlu0 %1881 }
0x110b   :  { %2925 = vpow2.f32 %v2041_v14  ;;  %2750 = vmatpush3.msra.mxu0 %v1882_v15  ;;  %v2349_v14 = vld [vmem:[#allocation5 + $0x40] sm:$0xff]  ;;  %v2350_v15 = vld [vmem:[#allocation5 + $0x48] sm:$0xff] }
0x110c   :  { %2752 = vmatmul.mubr.msk.f32.vlgmr.msra.gmra.mrb[26].mxu0 %vm248_vm2, %v1875_v3  ;;  %2759 = vmatprep.subr.mxu0 %v3014_v11  ;;  %v2344_v3 = vld [vmem:[#allocation5 + $0x18] sm:$0xff] }
0x110d   :  { %2761 = vmatprep.mubr.msk.f32.mxu0 %vm3015_vm1, %v3014_v11 }
0x110e   :  { %v2128_v2 = vpop.permute.xlu0 %2127 }
0x110f   :  { %2765 = vmatpush3.msra.mxu1 %v2128_v2  ;;  %v2352_v2 = vld [vmem:[#allocation5 + $0x58] sm:$0xff] }
0x1110   :  { %2840 = vmatprep.subr.bf16.mxu1 %v2839_v63 }
0x1115   :  { %v2926_v16 = vpop.eup %2925 }
0x1116   :  { %v2043_v17 = vsel %vm248_vm2, %v2926_v16, 0.0 }
0x1117   :  { %2044 = vadd.xlane.f32.xlu1 %v2043_v17  ;;  %v2351_v17 = vld [vmem:[#allocation5 + $0x50] sm:$0xff] }
0x1128   :  { %2049 = vrot.lane.b32.xlu1 %v3281_v27, %s3023_s14 }
0x112c   :  { %2206 = vrot.lane.b32.xlu1 %v3148_v25, %s3020_s11 }
0x11a4   :  { %v2045_v4 = vpop.xlane.xlu1 %2044 }
0x11a5   :  { %2927 = vrcp.f32 %v2045_v4  ;;  %v2859_v4 = vpack.c.bf16 %v2352_v2, %v2351_v17 }
0x11a8   :  { %v2050_v18 = vpop.permute.xlu1 %2049 }
0x11a9   :  { %2760 = vmatpush3.msra.mxu0 %v2050_v18  ;;  %v2353_v18 = vld [vmem:[#allocation5 + $0x60] sm:$0xff] }
0x11aa   :  { %2832 = vmatprep.subr.bf16.mxu0 %v2831_v57 }
0x11ac   :  { %v2207_v11 = vpop.permute.xlu1 %2206 }
0x11ad   :  { %v2209_v20 = vadd.f32 %v2207_v11, %v2204_v19  ;;  %v2354_v19 = vld [vmem:[#allocation5 + $0x68] sm:$0xff] }
0x11af   :  { %v2928_v23 = vpop.eup %2927  ;;  %v2211_v30 = vsel %vm62_vm0, %v2209_v20, 0.0 }
0x11b0   :  { %v2047_v42 = vmul.f32 %v2928_v23, %v2926_v16  ;;  %2212 = vadd.xlane.f32.xlu0 %v2211_v30  ;;  %v2855_v16 = vpack.c.bf16 %v2350_v15, %v2349_v14 }
0x11b2   :  { %2048 = vst.msk [vmem:[#allocation7 + $0x38] sm:$0xff] %vm248_vm2, %v2047_v42  ;;  %2762 = vmatmul.mubr.msk.f32.vlgmr.msra.gmra.mrb[28].mxu0 %vm248_vm2, %v2047_v42 }
0x11b3   :  { %2834 = vmatpush3.bf16.msra.mxu0 %v2831_v57 }
0x11b4   :  { %2836 = vmatprep.subr.bf16.mxu0 %v2835_v60 }
0x11b7   :  { %2838 = vmatpush3.bf16.msra.mxu0 %v2835_v60 }
0x11df   :  { %v1953_v25 = vpop.f32.mrb[26].mxu0 }
0x11e0   :  { %v1957_v27 = vadd.f32 %v1953_v25, %v1709_v62  ;;  %v2753_v29 = vpop.f32.mrb[27].mxu0  ;;  %v2343_v62 = vld [vmem:[#allocation5 + $0x10] sm:$0xff] }
0x11e1   :  { %v2843_v5 = vpack.c.bf16 %v2344_v3, %v2343_v62 }
0x123d   :  { %v2213_v1 = vpop.xlane.xlu0 %2212 }
0x123e   :  { %v2218_v31 = vmul.f32 0.03125, %v2213_v1  ;;  %v2355_v1 = vld [vmem:[#allocation5 + $0x70] sm:$0xff] }
0x1240   :  { %v2220_v32 = vsub.f32 %v2209_v20, %v2218_v31  ;;  %v2356_v31 = vld [vmem:[#allocation5 + $0x78] sm:$0xff] }
0x1242   :  { %v2222_v33 = vmul.f32 %v2220_v32, %v2220_v32 }
0x1244   :  { %v2224_v10 = vsel %vm62_vm0, %v2222_v33, 0.0  ;;  %v2256_v33 = vsub.s32 1, %v3135_v22 }
0x1245   :  { %2225 = vadd.xlane.f32.xlu0 %v2224_v10 }
0x1246   :  { %v2257_v10 = vrot.slane %v3145_v24, %v2256_v33 }
0x1285   :  { %v2121_v28 = vpop.f32.mrb[28].mxu0 }
0x1286   :  { %v2763_v34 = vpop.f32.mrb[29].mxu0  ;;  %2767 = vmatmul.mubr.msk.f32.vlgmr.msra.gmra.mrb[20].mxu1 %vm248_vm2, %v2121_v28 }
0x1287   :  { %2842 = vmatpush3.bf16.msra.mxu1 %v2839_v63 }
0x1288   :  { %2844 = vmatprep.subr.bf16.mxu1 %v2843_v5 }
0x128b   :  { %2846 = vmatpush3.bf16.msra.mxu1 %v2843_v5 }
0x128c   :  { %2848 = vmatprep.subr.bf16.mxu1 %v2847_v8 }
0x128f   :  { %2850 = vmatpush3.bf16.msra.mxu1 %v2847_v8 }
0x1290   :  { %2852 = vmatprep.subr.bf16.mxu1 %v2851_v13 }
0x1293   :  { %2854 = vmatpush3.bf16.msra.mxu1 %v2851_v13 }
0x1294   :  { %2856 = vmatprep.subr.bf16.mxu1 %v2855_v16 }
0x1297   :  { %2858 = vmatpush3.bf16.msra.mxu1 %v2855_v16 }
0x1298   :  { %2860 = vmatprep.subr.bf16.mxu1 %v2859_v4 }
0x129b   :  { %2862 = vmatpush3.bf16.msra.mxu1 %v2859_v4 }
0x12d2   :  { %v2226_v45 = vpop.xlane.xlu0 %2225 }
0x12d3   :  { %v2230_v46 = vmul.f32 0.03125, %v2226_v45 }
0x12d5   :  { %v2232_v47 = vadd.f32 1e-05, %v2230_v46 }
0x12d7   :  { %2929 = vrsqrt.f32 %v2232_v47 }
0x12e1   :  { %v2930_v48 = vpop.eup %2929 }
0x12e2   :  { %v2236_v49 = vmul.f32 %v2930_v48, %v2220_v32  ;;  %v2867_v32 = vpack.c.bf16 %v2356_v31, %v2355_v1 }
0x12e4   :  { %v2242_v51 = vmul.f32 %v3369_v43, %v2236_v49 }
0x1359   :  { %v2199_v35 = vpop.f32.mrb[20].mxu1 }
0x135a   :  { %v2203_v36 = vadd.f32 %v2199_v35, %v1957_v27  ;;  %v2768_v37 = vpop.f32.mrb[21].mxu1 }
0x135c   :  { %v2205_v38 = vadd.f32 %v2203_v36, %v3131_v21 }
0x135e   :  { %v2210_v39 = vadd.f32 %v2207_v11, %v2205_v38  ;;  %v2863_v11 = vpack.c.bf16 %v2354_v19, %v2353_v18 }
0x1360   :  { %v2214_v40 = vsel %vm62_vm0, %v2210_v39, 0.0  ;;  %2864 = vmatprep.subr.bf16.mxu1 %v2863_v11 }
0x1361   :  { %2215 = vadd.xlane.f32.xlu1 %v2214_v40  ;;  %2866 = vmatpush3.bf16.msra.mxu1 %v2863_v11 }
0x1362   :  { %2868 = vmatprep.subr.bf16.mxu1 %v2867_v32 }
0x1365   :  { %2870 = vmatpush3.bf16.msra.mxu1 %v2867_v32 }
0x1372   :  { %2245 = vrot.lane.b32.xlu1 %v3369_v43, %s3016_s0 }
0x13ee   :  { %v2216_v26 = vpop.xlane.xlu1 %2215 }
0x13ef   :  { %v2219_v21 = vmul.f32 0.03125, %v2216_v26 }
0x13f1   :  { %v2221_v50 = vsub.f32 %v2210_v39, %v2219_v21 }
0x13f2   :  { %v2246_v52 = vpop.permute.xlu1 %2245 }
0x13f3   :  { %v3374_v53 = vadd.f32 %v2246_v52, %v2242_v51  ;;  %v2223_v54 = vmul.f32 %v2221_v50, %v2221_v50 }
0x13f5   :  { %2777 = vmatprep.mubr.msk.f32.mxu0 %vm62_vm0, %v3374_v53  ;;  %v2227_v55 = vsel %vm62_vm0, %v2223_v54, 0.0 }
0x13f6   :  { %2228 = vadd.xlane.f32.xlu0 %v2227_v55 }
0x140c   :  { %2357 = vrot.lane.b32.xlu0 %v3369_v43, %s3013_s25 }
0x1483   :  { %v2229_v20 = vpop.xlane.xlu0 %2228 }
0x1484   :  { %v2231_v23 = vmul.f32 0.03125, %v2229_v20 }
0x1486   :  { %v2233_v30 = vadd.f32 1e-05, %v2231_v23 }
0x1487   :  { %v2358_v39 = vpop.permute.xlu0 %2357 }
0x1488   :  { %2931 = vrsqrt.f32 %v2233_v30 }
0x1492   :  { %v2932_v42 = vpop.eup %2931 }
0x1493   :  { %v2237_v25 = vmul.f32 %v2932_v42, %v2221_v50 }
0x1495   :  { %v2243_v27 = vmul.f32 %v3369_v43, %v2237_v25 }
0x1497   :  { %v2249_v29 = vadd.f32 %v2246_v52, %v2243_v27 }
0x1499   :  { %2778 = vmatmul.mubr.msk.f32.vlgmr.msra.gmra.mrb[30].mxu0 %vm62_vm0, %v2249_v29 }
0x156c   :  { %v2779_v28 = vpop.f32.mrb[30].mxu0 }
0x156d   :  { %v2336_v34 = vadd.f32 %v2779_v28, %v2257_v10  ;;  %v2330_v35 = vpop.f32.mrb[31].mxu0 }
0x156e   :  { %v2331_v36 = vadd.f32 %v2330_v35, %v2257_v10 }
0x156f   :  { %v2340_v38 = vmax.f32 %v2336_v34, 0.0 }
0x1570   :  { %v2339_v37 = vmax.f32 %v2331_v36, 0.0 }
0x1572   :  { %2812 = vmatprep.mubr.f32.mxu1 %v2339_v37 }
0x1573   :  { %2813 = vmatmul.mubr.f32.vlgmr.msra.gmra.mrb[22].mxu1 %v2340_v38 }
0x1646   :  { %v2814_v40 = vpop.f32.mrb[22].mxu1 }
0x1647   :  { %v2432_v41 = vadd.f32 %v2814_v40, %v2358_v39  ;;  %v2426_v45 = vpop.f32.mrb[23].mxu1 }
0x1648   :  { %v2427_v46 = vadd.f32 %v2426_v45, %v2358_v39 }
0x1649   :  { %v2436_v47 = vadd.f32 %v2432_v41, %v2249_v29 }
0x164a   :  { %v2435_v48 = vadd.f32 %v2427_v46, %v3374_v53 }
0x164b   :  { %v2440_v49 = vsel %vm62_vm0, %v2436_v47, 0.0 }
0x164c   :  { %2441 = vadd.xlane.f32.xlu0 %v2440_v49  ;;  %v2437_v26 = vsel %vm62_vm0, %v2435_v48, 0.0 }
0x164d   :  { %2438 = vadd.xlane.f32.xlu1 %v2437_v26 }
0x16d9   :  { %v2442_v21 = vpop.xlane.xlu0 %2441 }
0x16da   :  { %v2444_v50 = vmul.f32 0.03125, %v2442_v21  ;;  %v2439_v51 = vpop.xlane.xlu1 %2438 }
0x16db   :  { %v2443_v52 = vmul.f32 0.03125, %v2439_v51 }
0x16dc   :  { %v2446_v54 = vsub.f32 %v2436_v47, %v2444_v50 }
0x16dd   :  { %v2445_v55 = vsub.f32 %v2435_v48, %v2443_v52 }
0x16de   :  { %v2448_v0 = vmul.f32 %v2446_v54, %v2446_v54 }
0x16df   :  { %v2447_v56 = vmul.f32 %v2445_v55, %v2445_v55 }
0x16e0   :  { %v2452_v57 = vsel %vm62_vm0, %v2448_v0, 0.0 }
0x16e1   :  { %2453 = vadd.xlane.f32.xlu0 %v2452_v57  ;;  %v2449_v58 = vsel %vm62_vm0, %v2447_v56, 0.0 }
0x16e2   :  { %2450 = vadd.xlane.f32.xlu1 %v2449_v58 }
0x16f3   :  { %2463 = vrot.lane.b32.xlu1 %v3369_v43, %s3020_s11 }
0x16f4   :  { %2992 = shalt.err (!%p2989_p6)
}
0x16f5   :  { %s2993_s19 = scalar_lea.hbm %s3422_s5, 1024 }
0x16f6   :  { %p2994_p7 = scmp.ne.s32.totalorder %s3422_s5, %s2993_s19  ;;  %p2997_p8 = scmp.lt.u32.totalorder %s2993_s19, %s3422_s5 }
0x16f8   :  { %p2999_p9 = pnand %p2997_p8, %p2994_p7 }
0x16fa   :  { %3002 = shalt.err (!%p2999_p9)
}
0x16fb   :  { %2492 = dma.vmem_to_hbm [thread:$0]  %s2487_s16, 1024, %s3422_s5, [#allocation4], %s3010_s28, %s3010_s28, %s3011_s29   ;;  %v2470_v62 = vsub.s32 3, %v3135_v22 }
0x16fd   :  { %v2471_v7 = vrot.slane %v3145_v24, %v2470_v62 }
0x176e   :  { %v2454_v43 = vpop.xlane.xlu0 %2453 }
0x176f   :  { %v2456_v53 = vmul.f32 0.03125, %v2454_v43  ;;  %v2451_v59 = vpop.xlane.xlu1 %2450 }
0x1770   :  { %v2455_v60 = vmul.f32 0.03125, %v2451_v59 }
0x1771   :  { %v2458_v61 = vadd.f32 1e-05, %v2456_v53 }
0x1772   :  { %v2457_v44 = vadd.f32 1e-05, %v2455_v60 }
0x1773   :  { %2933 = vrsqrt.f32 %v2458_v61  ;;  %v2464_v3 = vpop.permute.xlu1 %2463 }
0x1774   :  { %2935 = vrsqrt.f32 %v2457_v44 }
0x177d   :  { %v2934_v63 = vpop.eup %2933 }
0x177e   :  { %v2936_v5 = vpop.eup %2935  ;;  %v2462_v6 = vmul.f32 %v2934_v63, %v2446_v54 }
0x177f   :  { %v2461_v8 = vmul.f32 %v2936_v5, %v2445_v55 }
0x1780   :  { %v2467_v9 = vmul.f32 %v2464_v3, %v2462_v6 }
0x1781   :  { %v2466_v12 = vmul.f32 %v2464_v3, %v2461_v8 }
0x1782   :  { %v2473_v13 = vadd.f32 %v2471_v7, %v2467_v9 }
0x1783   :  { %v2472_v14 = vadd.f32 %v2471_v7, %v2466_v12 }
0x1784   :  { %2475 = vst.msk [vmem:[%s3421_s4 + $0x8] sm:$0xff] %vm62_vm0, %v2473_v13 }
0x1785   :  { %2474 = vst.msk [vmem:[%s3421_s4] sm:$0xff] %vm62_vm0, %v2472_v14 }
0x1786   :  { %3007 = dma.done.wait [#allocation4], 1024  }
0x1787   :  { %3008 = vsyncadd [#allocation4], 4294966272 }
0x1788   :  { %2498 = vsyncpa [#allocation3], 1 }
0x1789   :  { %2499 = vsyncpa [#allocation6], 1 }
0x178a   :  { %2500 = vsyncpa [#allocation4], 1 }

</bundles_post_ra>
